<compile_context>
chip_gen: v5e
topology: v5e:2x2
jax: 0.10.0
libtpu: 0.0.40
codegen_flags: <defaults>
</compile_context>

<pallas_src>
import functools
import math

import jax
import jax.numpy as jnp
from jax.experimental import pallas as pl
from jax.experimental.pallas import tpu as pltpu


# ---------------------------------------------------------------------------
# helpers
# ---------------------------------------------------------------------------

def _m_tile(M, preferred=512):
    """Row tile: full dim when small (always a legal block), else a large
    sublane-aligned tile; the ragged last block is handled by Pallas."""
    if M <= preferred:
        return M
    return (preferred // 8) * 8


def _n_tile(N, preferred=512):
    """Column tile: full dim when small, else a lane-aligned (128-multiple)
    divisor of N if one exists, else 512 with a ragged last block."""
    if N <= preferred:
        return N
    t = (preferred // 128) * 128
    tt = t
    while tt >= 128:
        if N % tt == 0:
            return tt
        tt -= 128
    return t


def _gelu_exact(x):
    # exact (erf-based) GELU, matching HF ACT2FN["gelu"] / torch default.
    # TODO(synk): optionally switch to tanh-approx GELU (EUP) if accuracy permits.
    return 0.5 * x * (1.0 + jax.lax.erf(x * (1.0 / math.sqrt(2.0))))


# ---------------------------------------------------------------------------
# kernel 1: tiled linear (+ optional GELU)
# ---------------------------------------------------------------------------

def _linear_kernel(x_ref, w_ref, b_ref, o_ref, *, activation):
    # native-dtype (e.g. bf16) operands into the MXU, f32 accumulation only
    y = jnp.dot(x_ref[...], w_ref[...], preferred_element_type=jnp.float32)
    y = y + b_ref[...].astype(jnp.float32)
    if activation == "gelu":
        y = _gelu_exact(y)
    o_ref[...] = y.astype(o_ref.dtype)


def pallas_linear(x2d, w, b, *, activation=None, tm=512, tn=512,
                  vmem_limit_bytes=None):
    """x2d: [M, K], w: [K, N] (transposed vs torch), b: [N] -> [M, N]."""
    M, K = x2d.shape
    Kw, N = w.shape
    assert K == Kw
    tm = _m_tile(M, tm)
    tn = _n_tile(N, tn)
    b2d = b.reshape(1, N)

    return pl.pallas_call(
        functools.partial(_linear_kernel, activation=activation),
        out_shape=jax.ShapeDtypeStruct((M, N), x2d.dtype),
        grid_spec=pltpu.PrefetchScalarGridSpec(
            num_scalar_prefetch=0,
            grid=(pl.cdiv(M, tm), pl.cdiv(N, tn)),
            in_specs=[
                pl.BlockSpec((tm, K), lambda i, j: (i, 0)),
                pl.BlockSpec((K, tn), lambda i, j: (0, j)),
                pl.BlockSpec((1, tn), lambda i, j: (0, j)),
            ],
            out_specs=pl.BlockSpec((tm, tn), lambda i, j: (i, j)),
        ),
        compiler_params=pltpu.CompilerParams(
            dimension_semantics=("parallel", "parallel"),
            vmem_limit_bytes=vmem_limit_bytes,
        ),
    )(x2d, w, b2d)


# ---------------------------------------------------------------------------
# kernel 2: dense + residual + LayerNorm (BertSelfOutput / BertOutput)
# ---------------------------------------------------------------------------

def _dense_residual_ln_kernel(x_ref, w_ref, b_ref, res_ref, g_ref, bb_ref,
                              o_ref, *, eps):
    y = jnp.dot(x_ref[...], w_ref[...], preferred_element_type=jnp.float32)
    y = y + b_ref[...].astype(jnp.float32) + res_ref[...].astype(jnp.float32)
    mean = jnp.mean(y, axis=-1, keepdims=True)
    var = jnp.mean(jnp.square(y - mean), axis=-1, keepdims=True)
    yn = (y - mean) * jax.lax.rsqrt(var + eps)
    o_ref[...] = (yn * g_ref[...].astype(jnp.float32)
                  + bb_ref[...].astype(jnp.float32)).astype(o_ref.dtype)


def pallas_dense_residual_layernorm(x2d, w, b, residual2d, gamma, beta, *,
                                    eps, tm=512, vmem_limit_bytes=None):
    """LayerNorm(x2d @ w + b + residual2d); normalization over the full last dim."""
    M, K = x2d.shape
    Kw, N = w.shape
    assert K == Kw
    tm = _m_tile(M, tm)
    # TODO(synk): on v7x, single-buffer the constant-index weight block
    # (pipeline_mode=pl.Buffered(1)) or K-tile with an accumulator to halve the
    # resident weight footprint under the 64 MiB VMEM budget.
    return pl.pallas_call(
        functools.partial(_dense_residual_ln_kernel, eps=eps),
        out_shape=jax.ShapeDtypeStruct((M, N), x2d.dtype),
        grid_spec=pltpu.PrefetchScalarGridSpec(
            num_scalar_prefetch=0,
            grid=(pl.cdiv(M, tm),),
            in_specs=[
                pl.BlockSpec((tm, K), lambda i: (i, 0)),
                pl.BlockSpec((K, N), lambda i: (0, 0)),
                pl.BlockSpec((1, N), lambda i: (0, 0)),
                pl.BlockSpec((tm, N), lambda i: (i, 0)),
                pl.BlockSpec((1, N), lambda i: (0, 0)),
                pl.BlockSpec((1, N), lambda i: (0, 0)),
            ],
            out_specs=pl.BlockSpec((tm, N), lambda i: (i, 0)),
        ),
        compiler_params=pltpu.CompilerParams(
            dimension_semantics=("parallel",),
            vmem_limit_bytes=vmem_limit_bytes,
        ),
    )(x2d, w, b.reshape(1, N), residual2d, gamma.reshape(1, N),
      beta.reshape(1, N))


# ---------------------------------------------------------------------------
# kernel 3: multi-head self-attention, one (batch, head) per grid step
# ---------------------------------------------------------------------------

def _attention_kernel(q_ref, kt_ref, v_ref, o_ref, *, approx_recip):
    q = q_ref[0, 0]        # (S, d)   (already scaled by 1/sqrt(d) via Wq)
    kt = kt_ref[0, 0]      # (d, S)   (pre-transposed in the wrapper)
    v = v_ref[0, 0]        # (S, d)
    s = jnp.dot(q, kt, preferred_element_type=jnp.float32)        # (S, S) f32
    m = jnp.max(s, axis=-1, keepdims=True)
    p = jnp.exp(s - m)                                            # unnormalized
    l = jnp.sum(p, axis=-1, keepdims=True)
    ctx = jnp.dot(p.astype(v.dtype), v,
                  preferred_element_type=jnp.float32)             # (S, d) f32
    if approx_recip:
        ctx = ctx * pl.reciprocal(l, approx=True)                 # EUP slot
    else:
        ctx = ctx / l
    o_ref[0, 0] = ctx.astype(o_ref.dtype)


def pallas_attention(q, k_t, v, *, vmem_limit_bytes=None):
    """q/v: (B, nH, S, d); k_t: (B, nH, d, S) -> context (B, nH, S, d)."""
    B, nH, S, d = q.shape
    approx = q.dtype == jnp.bfloat16
    # TODO(synk): for long S, tile KV with online softmax (flash-style) so the
    # live (S, S) score block becomes independent of sequence length.
    return pl.pallas_call(
        functools.partial(_attention_kernel, approx_recip=approx),
        out_shape=jax.ShapeDtypeStruct((B, nH, S, d), q.dtype),
        grid_spec=pltpu.PrefetchScalarGridSpec(
            num_scalar_prefetch=0,
            grid=(B, nH),
            in_specs=[
                pl.BlockSpec((1, 1, S, d), lambda b, h: (b, h, 0, 0)),
                pl.BlockSpec((1, 1, d, S), lambda b, h: (b, h, 0, 0)),
                pl.BlockSpec((1, 1, S, d), lambda b, h: (b, h, 0, 0)),
            ],
            out_specs=pl.BlockSpec((1, 1, S, d), lambda b, h: (b, h, 0, 0)),
        ),
        compiler_params=pltpu.CompilerParams(
            dimension_semantics=("parallel", "parallel"),
            vmem_limit_bytes=vmem_limit_bytes,
        ),
    )(q, k_t, v)


# ---------------------------------------------------------------------------
# BertLayer / myBertEncoder forward (default-arg inference path)
# ---------------------------------------------------------------------------

def _prepare_layer_params(p, *, num_heads, compute_dtype=None):
    """Fold 1/sqrt(d) into the Q projection; weights to compute dtype,
    biases / LayerNorm params kept in f32."""
    H = p["ao_w"].shape[0]
    d = H // num_heads
    scale = 1.0 / math.sqrt(d)
    qkv_w = p["qkv_w"].astype(jnp.float32)
    qkv_b = p["qkv_b"].astype(jnp.float32)
    qkv_w = qkv_w.at[:, :H].multiply(scale)
    qkv_b = qkv_b.at[:H].multiply(scale)
    wd = compute_dtype if compute_dtype is not None else p["qkv_w"].dtype
    return {
        "qkv_w": qkv_w.astype(wd),
        "ao_w": p["ao_w"].astype(wd),
        "i_w": p["i_w"].astype(wd),
        "o_w": p["o_w"].astype(wd),
        "qkv_b": qkv_b,
        "ao_b": p["ao_b"].astype(jnp.float32),
        "i_b": p["i_b"].astype(jnp.float32),
        "o_b": p["o_b"].astype(jnp.float32),
        "ln1_g": p["ln1_g"].astype(jnp.float32),
        "ln1_b": p["ln1_b"].astype(jnp.float32),
        "ln2_g": p["ln2_g"].astype(jnp.float32),
        "ln2_b": p["ln2_b"].astype(jnp.float32),
    }


def pallas_bert_layer(hidden, p, *, num_heads, eps, vmem_limit_bytes=None):
    B, S, H = hidden.shape
    d = H // num_heads
    M = B * S
    x2d = hidden.reshape(M, H)

    # fused Q/K/V projection (one weight stream + one tiled matmul)
    qkv = pallas_linear(x2d, p["qkv_w"], p["qkv_b"],
                        vmem_limit_bytes=vmem_limit_bytes)

    # single fused reshape/transpose to head layout; K pre-transposed so QK^T
    # is a plain MXU matmul inside the kernel (no in-kernel XLU transpose).
    qkv5 = qkv.reshape(B, S, 3, num_heads, d)
    q = qkv5[:, :, 0].transpose(0, 2, 1, 3)      # (B, nH, S, d)
    k_t = qkv5[:, :, 1].transpose(0, 2, 3, 1)    # (B, nH, d, S)
    v = qkv5[:, :, 2].transpose(0, 2, 1, 3)      # (B, nH, S, d)

    ctx = pallas_attention(q, k_t, v, vmem_limit_bytes=vmem_limit_bytes)
    ctx2d = ctx.transpose(0, 2, 1, 3).reshape(M, H)

    # BertSelfOutput: dense + residual + LayerNorm
    h1 = pallas_dense_residual_layernorm(
        ctx2d, p["ao_w"], p["ao_b"], x2d, p["ln1_g"], p["ln1_b"], eps=eps,
        vmem_limit_bytes=vmem_limit_bytes)
    # BertIntermediate: dense + GELU
    inter = pallas_linear(h1, p["i_w"], p["i_b"], activation="gelu",
                          vmem_limit_bytes=vmem_limit_bytes)
    # BertOutput: dense + residual + LayerNorm
    h2 = pallas_dense_residual_layernorm(
        inter, p["o_w"], p["o_b"], h1, p["ln2_g"], p["ln2_b"], eps=eps,
        vmem_limit_bytes=vmem_limit_bytes)
    return h2.reshape(B, S, H)


def pallas_bert_encoder(hidden, layer_params, *, num_heads, eps,
                        compute_dtype=None, vmem_limit_bytes=None):
    # TODO(synk): attention_mask / head_mask additive masking, dropout,
    # cross-attention / past_key_values / use_cache / explain_pooler_outs
    # index_put and the output_attentions / output_hidden_states tuple outputs
    # are not implemented (forward defaults: None / False, inference).
    if compute_dtype is not None:
        hidden = hidden.astype(compute_dtype)
    for p in layer_params:
        pp = _prepare_layer_params(p, num_heads=num_heads,
                                   compute_dtype=compute_dtype)
        hidden = pallas_bert_layer(hidden, pp, num_heads=num_heads, eps=eps,
                                   vmem_limit_bytes=vmem_limit_bytes)
    return hidden


# ---------------------------------------------------------------------------
# pure-JAX reference for correctness check
# ---------------------------------------------------------------------------

def _ref_layer(hidden, p, *, num_heads, eps):
    B, S, H = hidden.shape
    d = H // num_heads
    x = hidden.reshape(-1, H)
    qkv = x @ p["qkv_w"] + p["qkv_b"]
    q, k, v = jnp.split(qkv, 3, axis=-1)

    def to_heads(t):
        return t.reshape(B, S, num_heads, d).transpose(0, 2, 1, 3)

    qh, kh, vh = to_heads(q), to_heads(k), to_heads(v)
    scores = jnp.einsum("bhqd,bhkd->bhqk", qh, kh) / math.sqrt(d)
    probs = jax.nn.softmax(scores, axis=-1)
    ctx = jnp.einsum("bhqk,bhkd->bhqd", probs, vh)
    ctx = ctx.transpose(0, 2, 1, 3).reshape(-1, H)

    def ln(y, g, b):
        mu = jnp.mean(y, axis=-1, keepdims=True)
        var = jnp.mean(jnp.square(y - mu), axis=-1, keepdims=True)
        return (y - mu) * jax.lax.rsqrt(var + eps) * g + b

    h1 = ln(ctx @ p["ao_w"] + p["ao_b"] + x, p["ln1_g"], p["ln1_b"])
    inter = _gelu_exact(h1 @ p["i_w"] + p["i_b"])
    h2 = ln(inter @ p["o_w"] + p["o_b"] + h1, p["ln2_g"], p["ln2_b"])
    return h2.reshape(B, S, H)


# ---------------------------------------------------------------------------
# main
# ---------------------------------------------------------------------------

if __name__ == "__main__":
    # small BERT-like config: hidden=32, heads=4, intermediate=128, 2 layers
    B, S, H, I, nH, L = 2, 8, 32, 128, 4, 2
    eps = 1e-12

    def make_layer_params(k):
        ks = jax.random.split(k, 12)
        s_h = 1.0 / math.sqrt(H)
        s_i = 1.0 / math.sqrt(I)
        return {
            "qkv_w": jax.random.normal(ks[0], (H, 3 * H), jnp.float32) * s_h,
            "qkv_b": jax.random.normal(ks[1], (3 * H,), jnp.float32) * 0.02,
            "ao_w": jax.random.normal(ks[2], (H, H), jnp.float32) * s_h,
            "ao_b": jax.random.normal(ks[3], (H,), jnp.float32) * 0.02,
            "ln1_g": 1.0 + 0.1 * jax.random.normal(ks[4], (H,), jnp.float32),
            "ln1_b": 0.1 * jax.random.normal(ks[5], (H,), jnp.float32),
            "i_w": jax.random.normal(ks[6], (H, I), jnp.float32) * s_h,
            "i_b": jax.random.normal(ks[7], (I,), jnp.float32) * 0.02,
            "o_w": jax.random.normal(ks[8], (I, H), jnp.float32) * s_i,
            "o_b": jax.random.normal(ks[9], (H,), jnp.float32) * 0.02,
            "ln2_g": 1.0 + 0.1 * jax.random.normal(ks[10], (H,), jnp.float32),
            "ln2_b": 0.1 * jax.random.normal(ks[11], (H,), jnp.float32),
        }

    key = jax.random.PRNGKey(0)
    key, kx, *layer_keys = jax.random.split(key, L + 2)
    hidden = jax.random.normal(kx, (B, S, H), jnp.float32)
    params = [make_layer_params(k) for k in layer_keys]

    # pure-JAX f32 reference
    ref = hidden
    for p in params:
        ref = _ref_layer(ref, p, num_heads=nH, eps=eps)

    # 1) f32 path: tight correctness check of kernel structure
    run_f32 = jax.jit(functools.partial(pallas_bert_encoder,
                                        num_heads=nH, eps=eps))
    out_f32 = jax.block_until_ready(run_f32(hidden, params))
    assert out_f32.shape == (B, S, H)
    err_f32 = float(jnp.max(jnp.abs(out_f32 - ref)))
    assert err_f32 < 5e-4, f"f32 max abs err {err_f32}"

    # 2) bf16 fast path (MXU-native operands, f32 accumulation): loose check
    run_bf16 = jax.jit(functools.partial(pallas_bert_encoder, num_heads=nH,
                                         eps=eps, compute_dtype=jnp.bfloat16))
    out_bf16 = jax.block_until_ready(run_bf16(hidden, params))
    assert out_bf16.shape == (B, S, H)
    err_bf16 = float(jnp.max(jnp.abs(out_bf16.astype(jnp.float32) - ref)))
    assert err_bf16 < 1e-1, f"bf16 max abs err {err_bf16}"

    print("KERNEL_OK")
</pallas_src>

<mosaic_0001>
module attributes {stable_mosaic.version = 11 : i64} {
  func.func @_linear_kernel(%arg0: i32, %arg1: i32, %arg2: memref<16x32xf32, #tpu.memory_space<vmem>>, %arg3: memref<32x96xf32, #tpu.memory_space<vmem>>, %arg4: memref<1x96xf32, #tpu.memory_space<vmem>>, %arg5: memref<16x96xf32, #tpu.memory_space<vmem>>) attributes {dimension_semantics = [#tpu.dimension_semantics<parallel>, #tpu.dimension_semantics<parallel>], iteration_bounds = array<i64: 1, 1>, scalar_prefetch = 0 : i64, scratch_operands = 0 : i64, tpu.core_type = #tpu.core_type<tc>, window_params = [{transform_indices = @transform_0, window_bounds = array<i64: 16, 32>}, {transform_indices = @transform_1, window_bounds = array<i64: 32, 96>}, {transform_indices = @transform_2, window_bounds = array<i64: 1, 96>}, {transform_indices = @transform_3, window_bounds = array<i64: 16, 96>}]} {
    %c0 = arith.constant 0 : index
    %c0_0 = arith.constant 0 : index
    %0 = vector.load %arg2[%c0, %c0_0] : memref<16x32xf32, #tpu.memory_space<vmem>>, vector<16x32xf32>
    %c0_1 = arith.constant 0 : index
    %c0_2 = arith.constant 0 : index
    %1 = vector.load %arg3[%c0_1, %c0_2] : memref<32x96xf32, #tpu.memory_space<vmem>>, vector<32x96xf32>
    %cst = arith.constant dense<0.000000e+00> : vector<16x96xf32>
    %2 = tpu.matmul %0, %1, %cst {dimension_numbers = #tpu.dot_dimension_numbers<[1], [0], [0], [1], [0, 0, 1, 1], [], []>} : vector<16x32xf32>, vector<32x96xf32>, vector<16x96xf32> -> vector<16x96xf32>
    %c0_3 = arith.constant 0 : index
    %c0_4 = arith.constant 0 : index
    %3 = vector.load %arg4[%c0_3, %c0_4] : memref<1x96xf32, #tpu.memory_space<vmem>>, vector<1x96xf32>
    %4 = vector.broadcast %3 : vector<1x96xf32> to vector<16x96xf32>
    %5 = arith.addf %2, %4 : vector<16x96xf32>
    %c0_5 = arith.constant 0 : index
    %c0_6 = arith.constant 0 : index
    %6 = vector.load %arg5[%c0_5, %c0_6] : memref<16x96xf32, #tpu.memory_space<vmem>>, vector<16x96xf32>
    tpu.vector_store %arg5[%c0_5, %c0_6], %5 {strides = array<i32>} : memref<16x96xf32, #tpu.memory_space<vmem>>, vector<16x96xf32>,
    return
  }
  func.func @transform_0(%arg0: i32, %arg1: i32) -> (i32, i32) {
    %c0_i32 = arith.constant 0 : i32
    %c0_i32_0 = arith.constant 0 : i32
    return %arg0, %c0_i32 : i32, i32
  }
  func.func @transform_1(%arg0: i32, %arg1: i32) -> (i32, i32) {
    %c0_i32 = arith.constant 0 : i32
    %c0_i32_0 = arith.constant 0 : i32
    return %c0_i32, %arg1 : i32, i32
  }
  func.func @transform_2(%arg0: i32, %arg1: i32) -> (i32, i32) {
    %c0_i32 = arith.constant 0 : i32
    %c0_i32_0 = arith.constant 0 : i32
    return %c0_i32, %arg1 : i32, i32
  }
  func.func @transform_3(%arg0: i32, %arg1: i32) -> (i32, i32) {
    %c0_i32 = arith.constant 0 : i32
    return %arg0, %arg1 : i32, i32
  }
}

module attributes {stable_mosaic.version = 11 : i64} {
  func.func @_attention_kernel(%arg0: i32, %arg1: i32, %arg2: memref<1x1x8x8xf32, #tpu.memory_space<vmem>>, %arg3: memref<1x1x8x8xf32, #tpu.memory_space<vmem>>, %arg4: memref<1x1x8x8xf32, #tpu.memory_space<vmem>>, %arg5: memref<1x1x8x8xf32, #tpu.memory_space<vmem>>) attributes {dimension_semantics = [#tpu.dimension_semantics<parallel>, #tpu.dimension_semantics<parallel>], iteration_bounds = array<i64: 2, 4>, scalar_prefetch = 0 : i64, scratch_operands = 0 : i64, tpu.core_type = #tpu.core_type<tc>, window_params = [{transform_indices = @transform_0, window_bounds = array<i64: 1, 1, 8, 8>}, {transform_indices = @transform_1, window_bounds = array<i64: 1, 1, 8, 8>}, {transform_indices = @transform_2, window_bounds = array<i64: 1, 1, 8, 8>}, {transform_indices = @transform_3, window_bounds = array<i64: 1, 1, 8, 8>}]} {
    %c0 = arith.constant 0 : index
    %c0_0 = arith.constant 0 : index
    %c0_1 = arith.constant 0 : index
    %c0_2 = arith.constant 0 : index
    %0 = vector.load %arg2[%c0, %c0_0, %c0_1, %c0_2] : memref<1x1x8x8xf32, #tpu.memory_space<vmem>>, vector<1x1x8x8xf32>
    %1 = vector.shape_cast %0 : vector<1x1x8x8xf32> to vector<8x8xf32>
    %c0_3 = arith.constant 0 : index
    %c0_4 = arith.constant 0 : index
    %c0_5 = arith.constant 0 : index
    %c0_6 = arith.constant 0 : index
    %2 = vector.load %arg3[%c0_3, %c0_4, %c0_5, %c0_6] : memref<1x1x8x8xf32, #tpu.memory_space<vmem>>, vector<1x1x8x8xf32>
    %3 = vector.shape_cast %2 : vector<1x1x8x8xf32> to vector<8x8xf32>
    %c0_7 = arith.constant 0 : index
    %c0_8 = arith.constant 0 : index
    %c0_9 = arith.constant 0 : index
    %c0_10 = arith.constant 0 : index
    %4 = vector.load %arg4[%c0_7, %c0_8, %c0_9, %c0_10] : memref<1x1x8x8xf32, #tpu.memory_space<vmem>>, vector<1x1x8x8xf32>
    %5 = vector.shape_cast %4 : vector<1x1x8x8xf32> to vector<8x8xf32>
    %cst = arith.constant dense<0.000000e+00> : vector<8x8xf32>
    %6 = tpu.matmul %1, %3, %cst {dimension_numbers = #tpu.dot_dimension_numbers<[1], [0], [0], [1], [0, 0, 1, 1], [], []>} : vector<8x8xf32>, vector<8x8xf32>, vector<8x8xf32> -> vector<8x8xf32>
    %cst_11 = arith.constant dense<0xFF800000> : vector<8xf32>
    %7 = vector.multi_reduction <maximumf>, %6, %cst_11 [1] : vector<8x8xf32> to vector<8xf32>
    %8 = vector.shape_cast %7 : vector<8xf32> to vector<8x1xf32>
    %9 = vector.broadcast %8 : vector<8x1xf32> to vector<8x8xf32>
    %10 = arith.subf %6, %9 : vector<8x8xf32>
    %11 = math.exp %10 : vector<8x8xf32>
    %cst_12 = arith.constant dense<0.000000e+00> : vector<8xf32>
    %12 = vector.multi_reduction <add>, %11, %cst_12 [1] : vector<8x8xf32> to vector<8xf32>
    %13 = vector.shape_cast %12 : vector<8xf32> to vector<8x1xf32>
    %cst_13 = arith.constant dense<0.000000e+00> : vector<8x8xf32>
    %14 = tpu.matmul %11, %5, %cst_13 {dimension_numbers = #tpu.dot_dimension_numbers<[1], [0], [0], [1], [0, 0, 1, 1], [], []>} : vector<8x8xf32>, vector<8x8xf32>, vector<8x8xf32> -> vector<8x8xf32>
    %15 = vector.broadcast %13 : vector<8x1xf32> to vector<8x8xf32>
    %16 = arith.divf %14, %15 : vector<8x8xf32>
    %c0_14 = arith.constant 0 : index
    %c0_15 = arith.constant 0 : index
    %c0_16 = arith.constant 0 : index
    %c0_17 = arith.constant 0 : index
    %17 = vector.load %arg5[%c0_14, %c0_15, %c0_16, %c0_17] : memref<1x1x8x8xf32, #tpu.memory_space<vmem>>, vector<1x1x8x8xf32>
    %18 = vector.shape_cast %17 : vector<1x1x8x8xf32> to vector<8x8xf32>
    %19 = vector.shape_cast %16 : vector<8x8xf32> to vector<1x1x8x8xf32>
    tpu.vector_store %arg5[%c0_14, %c0_15, %c0_16, %c0_17], %19 {strides = array<i32>} : memref<1x1x8x8xf32, #tpu.memory_space<vmem>>, vector<1x1x8x8xf32>,
    return
  }
  func.func @transform_0(%arg0: i32, %arg1: i32) -> (i32, i32, i32, i32) {
    %c0_i32 = arith.constant 0 : i32
    %c0_i32_0 = arith.constant 0 : i32
    %c0_i32_1 = arith.constant 0 : i32
    return %arg0, %arg1, %c0_i32, %c0_i32_0 : i32, i32, i32, i32
  }
  func.func @transform_1(%arg0: i32, %arg1: i32) -> (i32, i32, i32, i32) {
    %c0_i32 = arith.constant 0 : i32
    %c0_i32_0 = arith.constant 0 : i32
    %c0_i32_1 = arith.constant 0 : i32
    return %arg0, %arg1, %c0_i32, %c0_i32_0 : i32, i32, i32, i32
  }
  func.func @transform_2(%arg0: i32, %arg1: i32) -> (i32, i32, i32, i32) {
    %c0_i32 = arith.constant 0 : i32
    %c0_i32_0 = arith.constant 0 : i32
    %c0_i32_1 = arith.constant 0 : i32
    return %arg0, %arg1, %c0_i32, %c0_i32_0 : i32, i32, i32, i32
  }
  func.func @transform_3(%arg0: i32, %arg1: i32) -> (i32, i32, i32, i32) {
    %c0_i32 = arith.constant 0 : i32
    %c0_i32_0 = arith.constant 0 : i32
    %c0_i32_1 = arith.constant 0 : i32
    return %arg0, %arg1, %c0_i32, %c0_i32_0 : i32, i32, i32, i32
  }
}

module attributes {stable_mosaic.version = 11 : i64} {
  func.func @_dense_residual_ln_kernel(%arg0: i32, %arg1: memref<16x32xf32, #tpu.memory_space<vmem>>, %arg2: memref<32x32xf32, #tpu.memory_space<vmem>>, %arg3: memref<1x32xf32, #tpu.memory_space<vmem>>, %arg4: memref<16x32xf32, #tpu.memory_space<vmem>>, %arg5: memref<1x32xf32, #tpu.memory_space<vmem>>, %arg6: memref<1x32xf32, #tpu.memory_space<vmem>>, %arg7: memref<16x32xf32, #tpu.memory_space<vmem>>) attributes {dimension_semantics = [#tpu.dimension_semantics<parallel>], iteration_bounds = array<i64: 1>, scalar_prefetch = 0 : i64, scratch_operands = 0 : i64, tpu.core_type = #tpu.core_type<tc>, window_params = [{transform_indices = @transform_0, window_bounds = array<i64: 16, 32>}, {pipeline_mode = #tpu.pipeline_mode<synchronous>, transform_indices = @transform_1, window_bounds = array<i64: 32, 32>}, {pipeline_mode = #tpu.pipeline_mode<synchronous>, transform_indices = @transform_2, window_bounds = array<i64: 1, 32>}, {transform_indices = @transform_3, window_bounds = array<i64: 16, 32>}, {pipeline_mode = #tpu.pipeline_mode<synchronous>, transform_indices = @transform_4, window_bounds = array<i64: 1, 32>}, {pipeline_mode = #tpu.pipeline_mode<synchronous>, transform_indices = @transform_5, window_bounds = array<i64: 1, 32>}, {transform_indices = @transform_6, window_bounds = array<i64: 16, 32>}]} {
    %c0 = arith.constant 0 : index
    %c0_0 = arith.constant 0 : index
    %0 = vector.load %arg1[%c0, %c0_0] : memref<16x32xf32, #tpu.memory_space<vmem>>, vector<16x32xf32>
    %c0_1 = arith.constant 0 : index
    %c0_2 = arith.constant 0 : index
    %1 = vector.load %arg2[%c0_1, %c0_2] : memref<32x32xf32, #tpu.memory_space<vmem>>, vector<32x32xf32>
    %cst = arith.constant dense<0.000000e+00> : vector<16x32xf32>
    %2 = tpu.matmul %0, %1, %cst {dimension_numbers = #tpu.dot_dimension_numbers<[1], [0], [0], [1], [0, 0, 1, 1], [], []>} : vector<16x32xf32>, vector<32x32xf32>, vector<16x32xf32> -> vector<16x32xf32>
    %c0_3 = arith.constant 0 : index
    %c0_4 = arith.constant 0 : index
    %3 = vector.load %arg3[%c0_3, %c0_4] : memref<1x32xf32, #tpu.memory_space<vmem>>, vector<1x32xf32>
    %4 = vector.broadcast %3 : vector<1x32xf32> to vector<16x32xf32>
    %5 = arith.addf %2, %4 : vector<16x32xf32>
    %c0_5 = arith.constant 0 : index
    %c0_6 = arith.constant 0 : index
    %6 = vector.load %arg4[%c0_5, %c0_6] : memref<16x32xf32, #tpu.memory_space<vmem>>, vector<16x32xf32>
    %7 = arith.addf %5, %6 : vector<16x32xf32>
    %cst_7 = arith.constant dense<0.000000e+00> : vector<16xf32>
    %8 = vector.multi_reduction <add>, %7, %cst_7 [1] : vector<16x32xf32> to vector<16xf32>
    %9 = vector.shape_cast %8 : vector<16xf32> to vector<16x1xf32>
    %cst_8 = arith.constant 3.200000e+01 : f32
    %10 = vector.broadcast %cst_8 : f32 to vector<16x1xf32>
    %11 = arith.divf %9, %10 : vector<16x1xf32>
    %12 = vector.broadcast %11 : vector<16x1xf32> to vector<16x32xf32>
    %13 = arith.subf %7, %12 : vector<16x32xf32>
    %14 = arith.mulf %13, %13 : vector<16x32xf32>
    %cst_9 = arith.constant dense<0.000000e+00> : vector<16xf32>
    %15 = vector.multi_reduction <add>, %14, %cst_9 [1] : vector<16x32xf32> to vector<16xf32>
    %16 = vector.shape_cast %15 : vector<16xf32> to vector<16x1xf32>
    %cst_10 = arith.constant 3.200000e+01 : f32
    %17 = vector.broadcast %cst_10 : f32 to vector<16x1xf32>
    %18 = arith.divf %16, %17 : vector<16x1xf32>
    %19 = vector.broadcast %11 : vector<16x1xf32> to vector<16x32xf32>
    %20 = arith.subf %7, %19 : vector<16x32xf32>
    %cst_11 = arith.constant 9.99999996E-13 : f32
    %21 = vector.broadcast %cst_11 : f32 to vector<16x1xf32>
    %22 = arith.addf %18, %21 : vector<16x1xf32>
    %23 = math.rsqrt %22 : vector<16x1xf32>
    %24 = vector.broadcast %23 : vector<16x1xf32> to vector<16x32xf32>
    %25 = arith.mulf %20, %24 : vector<16x32xf32>
    %c0_12 = arith.constant 0 : index
    %c0_13 = arith.constant 0 : index
    %26 = vector.load %arg5[%c0_12, %c0_13] : memref<1x32xf32, #tpu.memory_space<vmem>>, vector<1x32xf32>
    %27 = vector.broadcast %26 : vector<1x32xf32> to vector<16x32xf32>
    %28 = arith.mulf %25, %27 : vector<16x32xf32>
    %c0_14 = arith.constant 0 : index
    %c0_15 = arith.constant 0 : index
    %29 = vector.load %arg6[%c0_14, %c0_15] : memref<1x32xf32, #tpu.memory_space<vmem>>, vector<1x32xf32>
    %30 = vector.broadcast %29 : vector<1x32xf32> to vector<16x32xf32>
    %31 = arith.addf %28, %30 : vector<16x32xf32>
    %c0_16 = arith.constant 0 : index
    %c0_17 = arith.constant 0 : index
    %32 = vector.load %arg7[%c0_16, %c0_17] : memref<16x32xf32, #tpu.memory_space<vmem>>, vector<16x32xf32>
    tpu.vector_store %arg7[%c0_16, %c0_17], %31 {strides = array<i32>} : memref<16x32xf32, #tpu.memory_space<vmem>>, vector<16x32xf32>,
    return
  }
  func.func @transform_0(%arg0: i32) -> (i32, i32) {
    %c0_i32 = arith.constant 0 : i32
    %c0_i32_0 = arith.constant 0 : i32
    return %arg0, %c0_i32 : i32, i32
  }
  func.func @transform_1(%arg0: i32) -> (i32, i32) {
    %c0_i32 = arith.constant 0 : i32
    %c0_i32_0 = arith.constant 0 : i32
    %c0_i32_1 = arith.constant 0 : i32
    return %c0_i32, %c0_i32_0 : i32, i32
  }
  func.func @transform_2(%arg0: i32) -> (i32, i32) {
    %c0_i32 = arith.constant 0 : i32
    %c0_i32_0 = arith.constant 0 : i32
    %c0_i32_1 = arith.constant 0 : i32
    return %c0_i32, %c0_i32_0 : i32, i32
  }
  func.func @transform_3(%arg0: i32) -> (i32, i32) {
    %c0_i32 = arith.constant 0 : i32
    %c0_i32_0 = arith.constant 0 : i32
    return %arg0, %c0_i32 : i32, i32
  }
  func.func @transform_4(%arg0: i32) -> (i32, i32) {
    %c0_i32 = arith.constant 0 : i32
    %c0_i32_0 = arith.constant 0 : i32
    %c0_i32_1 = arith.constant 0 : i32
    return %c0_i32, %c0_i32_0 : i32, i32
  }
  func.func @transform_5(%arg0: i32) -> (i32, i32) {
    %c0_i32 = arith.constant 0 : i32
    %c0_i32_0 = arith.constant 0 : i32
    %c0_i32_1 = arith.constant 0 : i32
    return %c0_i32, %c0_i32_0 : i32, i32
  }
  func.func @transform_6(%arg0: i32) -> (i32, i32) {
    %c0_i32 = arith.constant 0 : i32
    %c0_i32_0 = arith.constant 0 : i32
    return %arg0, %c0_i32 : i32, i32
  }
}

module attributes {stable_mosaic.version = 11 : i64} {
  func.func @_linear_kernel(%arg0: i32, %arg1: i32, %arg2: memref<16x32xf32, #tpu.memory_space<vmem>>, %arg3: memref<32x128xf32, #tpu.memory_space<vmem>>, %arg4: memref<1x128xf32, #tpu.memory_space<vmem>>, %arg5: memref<16x128xf32, #tpu.memory_space<vmem>>) attributes {dimension_semantics = [#tpu.dimension_semantics<parallel>, #tpu.dimension_semantics<parallel>], iteration_bounds = array<i64: 1, 1>, scalar_prefetch = 0 : i64, scratch_operands = 0 : i64, tpu.core_type = #tpu.core_type<tc>, window_params = [{transform_indices = @transform_0, window_bounds = array<i64: 16, 32>}, {transform_indices = @transform_1, window_bounds = array<i64: 32, 128>}, {transform_indices = @transform_2, window_bounds = array<i64: 1, 128>}, {transform_indices = @transform_3, window_bounds = array<i64: 16, 128>}]} {
    %c0 = arith.constant 0 : index
    %c0_0 = arith.constant 0 : index
    %0 = vector.load %arg2[%c0, %c0_0] : memref<16x32xf32, #tpu.memory_space<vmem>>, vector<16x32xf32>
    %c0_1 = arith.constant 0 : index
    %c0_2 = arith.constant 0 : index
    %1 = vector.load %arg3[%c0_1, %c0_2] : memref<32x128xf32, #tpu.memory_space<vmem>>, vector<32x128xf32>
    %cst = arith.constant dense<0.000000e+00> : vector<16x128xf32>
    %2 = tpu.matmul %0, %1, %cst {dimension_numbers = #tpu.dot_dimension_numbers<[1], [0], [0], [1], [0, 0, 1, 1], [], []>} : vector<16x32xf32>, vector<32x128xf32>, vector<16x128xf32> -> vector<16x128xf32>
    %c0_3 = arith.constant 0 : index
    %c0_4 = arith.constant 0 : index
    %3 = vector.load %arg4[%c0_3, %c0_4] : memref<1x128xf32, #tpu.memory_space<vmem>>, vector<1x128xf32>
    %4 = vector.broadcast %3 : vector<1x128xf32> to vector<16x128xf32>
    %5 = arith.addf %2, %4 : vector<16x128xf32>
    %cst_5 = arith.constant 5.000000e-01 : f32
    %6 = vector.broadcast %cst_5 : f32 to vector<16x128xf32>
    %7 = arith.mulf %6, %5 : vector<16x128xf32>
    %cst_6 = arith.constant 0.707106769 : f32
    %8 = vector.broadcast %cst_6 : f32 to vector<16x128xf32>
    %9 = arith.mulf %5, %8 : vector<16x128xf32>
    %10 = math.erf %9 : vector<16x128xf32>
    %cst_7 = arith.constant 1.000000e+00 : f32
    %11 = vector.broadcast %cst_7 : f32 to vector<16x128xf32>
    %12 = arith.addf %11, %10 : vector<16x128xf32>
    %13 = arith.mulf %7, %12 : vector<16x128xf32>
    %c0_8 = arith.constant 0 : index
    %c0_9 = arith.constant 0 : index
    %14 = vector.load %arg5[%c0_8, %c0_9] : memref<16x128xf32, #tpu.memory_space<vmem>>, vector<16x128xf32>
    tpu.vector_store %arg5[%c0_8, %c0_9], %13 {strides = array<i32>} : memref<16x128xf32, #tpu.memory_space<vmem>>, vector<16x128xf32>,
    return
  }
  func.func @transform_0(%arg0: i32, %arg1: i32) -> (i32, i32) {
    %c0_i32 = arith.constant 0 : i32
    %c0_i32_0 = arith.constant 0 : i32
    return %arg0, %c0_i32 : i32, i32
  }
  func.func @transform_1(%arg0: i32, %arg1: i32) -> (i32, i32) {
    %c0_i32 = arith.constant 0 : i32
    %c0_i32_0 = arith.constant 0 : i32
    return %c0_i32, %arg1 : i32, i32
  }
  func.func @transform_2(%arg0: i32, %arg1: i32) -> (i32, i32) {
    %c0_i32 = arith.constant 0 : i32
    %c0_i32_0 = arith.constant 0 : i32
    return %c0_i32, %arg1 : i32, i32
  }
  func.func @transform_3(%arg0: i32, %arg1: i32) -> (i32, i32) {
    %c0_i32 = arith.constant 0 : i32
    return %arg0, %arg1 : i32, i32
  }
}

module attributes {stable_mosaic.version = 11 : i64} {
  func.func @_dense_residual_ln_kernel(%arg0: i32, %arg1: memref<16x128xf32, #tpu.memory_space<vmem>>, %arg2: memref<128x32xf32, #tpu.memory_space<vmem>>, %arg3: memref<1x32xf32, #tpu.memory_space<vmem>>, %arg4: memref<16x32xf32, #tpu.memory_space<vmem>>, %arg5: memref<1x32xf32, #tpu.memory_space<vmem>>, %arg6: memref<1x32xf32, #tpu.memory_space<vmem>>, %arg7: memref<16x32xf32, #tpu.memory_space<vmem>>) attributes {dimension_semantics = [#tpu.dimension_semantics<parallel>], iteration_bounds = array<i64: 1>, scalar_prefetch = 0 : i64, scratch_operands = 0 : i64, tpu.core_type = #tpu.core_type<tc>, window_params = [{transform_indices = @transform_0, window_bounds = array<i64: 16, 128>}, {pipeline_mode = #tpu.pipeline_mode<synchronous>, transform_indices = @transform_1, window_bounds = array<i64: 128, 32>}, {pipeline_mode = #tpu.pipeline_mode<synchronous>, transform_indices = @transform_2, window_bounds = array<i64: 1, 32>}, {transform_indices = @transform_3, window_bounds = array<i64: 16, 32>}, {pipeline_mode = #tpu.pipeline_mode<synchronous>, transform_indices = @transform_4, window_bounds = array<i64: 1, 32>}, {pipeline_mode = #tpu.pipeline_mode<synchronous>, transform_indices = @transform_5, window_bounds = array<i64: 1, 32>}, {transform_indices = @transform_6, window_bounds = array<i64: 16, 32>}]} {
    %c0 = arith.constant 0 : index
    %c0_0 = arith.constant 0 : index
    %0 = vector.load %arg1[%c0, %c0_0] : memref<16x128xf32, #tpu.memory_space<vmem>>, vector<16x128xf32>
    %c0_1 = arith.constant 0 : index
    %c0_2 = arith.constant 0 : index
    %1 = vector.load %arg2[%c0_1, %c0_2] : memref<128x32xf32, #tpu.memory_space<vmem>>, vector<128x32xf32>
    %cst = arith.constant dense<0.000000e+00> : vector<16x32xf32>
    %2 = tpu.matmul %0, %1, %cst {dimension_numbers = #tpu.dot_dimension_numbers<[1], [0], [0], [1], [0, 0, 1, 1], [], []>} : vector<16x128xf32>, vector<128x32xf32>, vector<16x32xf32> -> vector<16x32xf32>
    %c0_3 = arith.constant 0 : index
    %c0_4 = arith.constant 0 : index
    %3 = vector.load %arg3[%c0_3, %c0_4] : memref<1x32xf32, #tpu.memory_space<vmem>>, vector<1x32xf32>
    %4 = vector.broadcast %3 : vector<1x32xf32> to vector<16x32xf32>
    %5 = arith.addf %2, %4 : vector<16x32xf32>
    %c0_5 = arith.constant 0 : index
    %c0_6 = arith.constant 0 : index
    %6 = vector.load %arg4[%c0_5, %c0_6] : memref<16x32xf32, #tpu.memory_space<vmem>>, vector<16x32xf32>
    %7 = arith.addf %5, %6 : vector<16x32xf32>
    %cst_7 = arith.constant dense<0.000000e+00> : vector<16xf32>
    %8 = vector.multi_reduction <add>, %7, %cst_7 [1] : vector<16x32xf32> to vector<16xf32>
    %9 = vector.shape_cast %8 : vector<16xf32> to vector<16x1xf32>
    %cst_8 = arith.constant 3.200000e+01 : f32
    %10 = vector.broadcast %cst_8 : f32 to vector<16x1xf32>
    %11 = arith.divf %9, %10 : vector<16x1xf32>
    %12 = vector.broadcast %11 : vector<16x1xf32> to vector<16x32xf32>
    %13 = arith.subf %7, %12 : vector<16x32xf32>
    %14 = arith.mulf %13, %13 : vector<16x32xf32>
    %cst_9 = arith.constant dense<0.000000e+00> : vector<16xf32>
    %15 = vector.multi_reduction <add>, %14, %cst_9 [1] : vector<16x32xf32> to vector<16xf32>
    %16 = vector.shape_cast %15 : vector<16xf32> to vector<16x1xf32>
    %cst_10 = arith.constant 3.200000e+01 : f32
    %17 = vector.broadcast %cst_10 : f32 to vector<16x1xf32>
    %18 = arith.divf %16, %17 : vector<16x1xf32>
    %19 = vector.broadcast %11 : vector<16x1xf32> to vector<16x32xf32>
    %20 = arith.subf %7, %19 : vector<16x32xf32>
    %cst_11 = arith.constant 9.99999996E-13 : f32
    %21 = vector.broadcast %cst_11 : f32 to vector<16x1xf32>
    %22 = arith.addf %18, %21 : vector<16x1xf32>
    %23 = math.rsqrt %22 : vector<16x1xf32>
    %24 = vector.broadcast %23 : vector<16x1xf32> to vector<16x32xf32>
    %25 = arith.mulf %20, %24 : vector<16x32xf32>
    %c0_12 = arith.constant 0 : index
    %c0_13 = arith.constant 0 : index
    %26 = vector.load %arg5[%c0_12, %c0_13] : memref<1x32xf32, #tpu.memory_space<vmem>>, vector<1x32xf32>
    %27 = vector.broadcast %26 : vector<1x32xf32> to vector<16x32xf32>
    %28 = arith.mulf %25, %27 : vector<16x32xf32>
    %c0_14 = arith.constant 0 : index
    %c0_15 = arith.constant 0 : index
    %29 = vector.load %arg6[%c0_14, %c0_15] : memref<1x32xf32, #tpu.memory_space<vmem>>, vector<1x32xf32>
    %30 = vector.broadcast %29 : vector<1x32xf32> to vector<16x32xf32>
    %31 = arith.addf %28, %30 : vector<16x32xf32>
    %c0_16 = arith.constant 0 : index
    %c0_17 = arith.constant 0 : index
    %32 = vector.load %arg7[%c0_16, %c0_17] : memref<16x32xf32, #tpu.memory_space<vmem>>, vector<16x32xf32>
    tpu.vector_store %arg7[%c0_16, %c0_17], %31 {strides = array<i32>} : memref<16x32xf32, #tpu.memory_space<vmem>>, vector<16x32xf32>,
    return
  }
  func.func @transform_0(%arg0: i32) -> (i32, i32) {
    %c0_i32 = arith.constant 0 : i32
    %c0_i32_0 = arith.constant 0 : i32
    return %arg0, %c0_i32 : i32, i32
  }
  func.func @transform_1(%arg0: i32) -> (i32, i32) {
    %c0_i32 = arith.constant 0 : i32
    %c0_i32_0 = arith.constant 0 : i32
    %c0_i32_1 = arith.constant 0 : i32
    return %c0_i32, %c0_i32_0 : i32, i32
  }
  func.func @transform_2(%arg0: i32) -> (i32, i32) {
    %c0_i32 = arith.constant 0 : i32
    %c0_i32_0 = arith.constant 0 : i32
    %c0_i32_1 = arith.constant 0 : i32
    return %c0_i32, %c0_i32_0 : i32, i32
  }
  func.func @transform_3(%arg0: i32) -> (i32, i32) {
    %c0_i32 = arith.constant 0 : i32
    %c0_i32_0 = arith.constant 0 : i32
    return %arg0, %c0_i32 : i32, i32
  }
  func.func @transform_4(%arg0: i32) -> (i32, i32) {
    %c0_i32 = arith.constant 0 : i32
    %c0_i32_0 = arith.constant 0 : i32
    %c0_i32_1 = arith.constant 0 : i32
    return %c0_i32, %c0_i32_0 : i32, i32
  }
  func.func @transform_5(%arg0: i32) -> (i32, i32) {
    %c0_i32 = arith.constant 0 : i32
    %c0_i32_0 = arith.constant 0 : i32
    %c0_i32_1 = arith.constant 0 : i32
    return %c0_i32, %c0_i32_0 : i32, i32
  }
  func.func @transform_6(%arg0: i32) -> (i32, i32) {
    %c0_i32 = arith.constant 0 : i32
    %c0_i32_0 = arith.constant 0 : i32
    return %arg0, %c0_i32 : i32, i32
  }
}

module attributes {stable_mosaic.version = 11 : i64} {
  func.func @_dense_residual_ln_kernel(%arg0: i32, %arg1: memref<16x128xf32, #tpu.memory_space<vmem>>, %arg2: memref<128x32xf32, #tpu.memory_space<vmem>>, %arg3: memref<1x32xf32, #tpu.memory_space<vmem>>, %arg4: memref<16x32xf32, #tpu.memory_space<vmem>>, %arg5: memref<1x32xf32, #tpu.memory_space<vmem>>, %arg6: memref<1x32xf32, #tpu.memory_space<vmem>>, %arg7: memref<16x32xf32, #tpu.memory_space<vmem>>) attributes {dimension_semantics = [#tpu.dimension_semantics<parallel>], iteration_bounds = array<i64: 1>, scalar_prefetch = 0 : i64, scratch_operands = 0 : i64, tpu.core_type = #tpu.core_type<tc>, window_params = [{transform_indices = @transform_0, window_bounds = array<i64: 16, 128>}, {pipeline_mode = #tpu.pipeline_mode<synchronous>, transform_indices = @transform_1, window_bounds = array<i64: 128, 32>}, {pipeline_mode = #tpu.pipeline_mode<synchronous>, transform_indices = @transform_2, window_bounds = array<i64: 1, 32>}, {transform_indices = @transform_3, window_bounds = array<i64: 16, 32>}, {pipeline_mode = #tpu.pipeline_mode<synchronous>, transform_indices = @transform_4, window_bounds = array<i64: 1, 32>}, {pipeline_mode = #tpu.pipeline_mode<synchronous>, transform_indices = @transform_5, window_bounds = array<i64: 1, 32>}, {transform_indices = @transform_6, window_bounds = array<i64: 16, 32>}]} {
    %c0 = arith.constant 0 : index
    %c0_0 = arith.constant 0 : index
    %0 = vector.load %arg1[%c0, %c0_0] : memref<16x128xf32, #tpu.memory_space<vmem>>, vector<16x128xf32>
    %c0_1 = arith.constant 0 : index
    %c0_2 = arith.constant 0 : index
    %1 = vector.load %arg2[%c0_1, %c0_2] : memref<128x32xf32, #tpu.memory_space<vmem>>, vector<128x32xf32>
    %cst = arith.constant dense<0.000000e+00> : vector<16x32xf32>
    %2 = tpu.matmul %0, %1, %cst {dimension_numbers = #tpu.dot_dimension_numbers<[1], [0], [0], [1], [0, 0, 1, 1], [], []>} : vector<16x128xf32>, vector<128x32xf32>, vector<16x32xf32> -> vector<16x32xf32>
    %c0_3 = arith.constant 0 : index
    %c0_4 = arith.constant 0 : index
    %3 = vector.load %arg3[%c0_3, %c0_4] : memref<1x32xf32, #tpu.memory_space<vmem>>, vector<1x32xf32>
    %4 = vector.broadcast %3 : vector<1x32xf32> to vector<16x32xf32>
    %5 = arith.addf %2, %4 : vector<16x32xf32>
    %c0_5 = arith.constant 0 : index
    %c0_6 = arith.constant 0 : index
    %6 = vector.load %arg4[%c0_5, %c0_6] : memref<16x32xf32, #tpu.memory_space<vmem>>, vector<16x32xf32>
    %7 = arith.addf %5, %6 : vector<16x32xf32>
    %cst_7 = arith.constant dense<0.000000e+00> : vector<16xf32>
    %8 = vector.multi_reduction <add>, %7, %cst_7 [1] : vector<16x32xf32> to vector<16xf32>
    %9 = vector.shape_cast %8 : vector<16xf32> to vector<16x1xf32>
    %cst_8 = arith.constant 3.200000e+01 : f32
    %10 = vector.broadcast %cst_8 : f32 to vector<16x1xf32>
    %11 = arith.divf %9, %10 : vector<16x1xf32>
    %12 = vector.broadcast %11 : vector<16x1xf32> to vector<16x32xf32>
    %13 = arith.subf %7, %12 : vector<16x32xf32>
    %14 = arith.mulf %13, %13 : vector<16x32xf32>
    %cst_9 = arith.constant dense<0.000000e+00> : vector<16xf32>
    %15 = vector.multi_reduction <add>, %14, %cst_9 [1] : vector<16x32xf32> to vector<16xf32>
    %16 = vector.shape_cast %15 : vector<16xf32> to vector<16x1xf32>
    %cst_10 = arith.constant 3.200000e+01 : f32
    %17 = vector.broadcast %cst_10 : f32 to vector<16x1xf32>
    %18 = arith.divf %16, %17 : vector<16x1xf32>
    %19 = vector.broadcast %11 : vector<16x1xf32> to vector<16x32xf32>
    %20 = arith.subf %7, %19 : vector<16x32xf32>
    %cst_11 = arith.constant 9.99999996E-13 : f32
    %21 = vector.broadcast %cst_11 : f32 to vector<16x1xf32>
    %22 = arith.addf %18, %21 : vector<16x1xf32>
    %23 = math.rsqrt %22 : vector<16x1xf32>
    %24 = vector.broadcast %23 : vector<16x1xf32> to vector<16x32xf32>
    %25 = arith.mulf %20, %24 : vector<16x32xf32>
    %c0_12 = arith.constant 0 : index
    %c0_13 = arith.constant 0 : index
    %26 = vector.load %arg5[%c0_12, %c0_13] : memref<1x32xf32, #tpu.memory_space<vmem>>, vector<1x32xf32>
    %27 = vector.broadcast %26 : vector<1x32xf32> to vector<16x32xf32>
    %28 = arith.mulf %25, %27 : vector<16x32xf32>
    %c0_14 = arith.constant 0 : index
    %c0_15 = arith.constant 0 : index
    %29 = vector.load %arg6[%c0_14, %c0_15] : memref<1x32xf32, #tpu.memory_space<vmem>>, vector<1x32xf32>
    %30 = vector.broadcast %29 : vector<1x32xf32> to vector<16x32xf32>
    %31 = arith.addf %28, %30 : vector<16x32xf32>
    %c0_16 = arith.constant 0 : index
    %c0_17 = arith.constant 0 : index
    %32 = vector.load %arg7[%c0_16, %c0_17] : memref<16x32xf32, #tpu.memory_space<vmem>>, vector<16x32xf32>
    tpu.vector_store %arg7[%c0_16, %c0_17], %31 {strides = array<i32>} : memref<16x32xf32, #tpu.memory_space<vmem>>, vector<16x32xf32>,
    return
  }
  func.func @transform_0(%arg0: i32) -> (i32, i32) {
    %c0_i32 = arith.constant 0 : i32
    %c0_i32_0 = arith.constant 0 : i32
    return %arg0, %c0_i32 : i32, i32
  }
  func.func @transform_1(%arg0: i32) -> (i32, i32) {
    %c0_i32 = arith.constant 0 : i32
    %c0_i32_0 = arith.constant 0 : i32
    %c0_i32_1 = arith.constant 0 : i32
    return %c0_i32, %c0_i32_0 : i32, i32
  }
  func.func @transform_2(%arg0: i32) -> (i32, i32) {
    %c0_i32 = arith.constant 0 : i32
    %c0_i32_0 = arith.constant 0 : i32
    %c0_i32_1 = arith.constant 0 : i32
    return %c0_i32, %c0_i32_0 : i32, i32
  }
  func.func @transform_3(%arg0: i32) -> (i32, i32) {
    %c0_i32 = arith.constant 0 : i32
    %c0_i32_0 = arith.constant 0 : i32
    return %arg0, %c0_i32 : i32, i32
  }
  func.func @transform_4(%arg0: i32) -> (i32, i32) {
    %c0_i32 = arith.constant 0 : i32
    %c0_i32_0 = arith.constant 0 : i32
    %c0_i32_1 = arith.constant 0 : i32
    return %c0_i32, %c0_i32_0 : i32, i32
  }
  func.func @transform_5(%arg0: i32) -> (i32, i32) {
    %c0_i32 = arith.constant 0 : i32
    %c0_i32_0 = arith.constant 0 : i32
    %c0_i32_1 = arith.constant 0 : i32
    return %c0_i32, %c0_i32_0 : i32, i32
  }
  func.func @transform_6(%arg0: i32) -> (i32, i32) {
    %c0_i32 = arith.constant 0 : i32
    %c0_i32_0 = arith.constant 0 : i32
    return %arg0, %c0_i32 : i32, i32
  }
}

</mosaic_0001>

<bundles_post_ra>
// kernel: pallas_bert_encoder.10
= control target key start
LH: loop header
LB: loop body
LE: loop exit
PB: predicated region body
PF: predicated region fallthrough
CT: control target
= control target key end

     0   :  { %vm24_vm0 = vcmask 261120   ;;  %vm54_vm1 = vcmask 785408   ;;  %s115_s1 = inlined_call_operand.vmem [shape: f32[32,96], index: 1, kind: input, shape index: {}]   ;;  %s116_s2 = inlined_call_operand.vmem [shape: f32[1,96], index: 2, kind: input, shape index: {}]   ;;  %s117_s0 = inlined_call_operand.vmem [shape: f32[16,32], index: 0, kind: input, shape index: {}]   ;;  %s118_s3 = inlined_call_operand.vmem [shape: f32[16,96], index: 3, kind: output, shape index: {}]  }
   0x1   :  { %v19_v0 = vld [vmem:[%s115_s1 + $0x18] sm:$0xff]  ;;  %v18_v1 = vld [vmem:[%s115_s1 + $0x10] sm:$0xff]  ;;  %v17_v2 = vld [vmem:[%s115_s1 + $0x8] sm:$0xff] }
   0x2   :  { %43 = vmatpush.msra.mxu0 %v19_v0  ;;  %63 = vmatpush.msra.mxu1 %v19_v0  ;;  %v16_v3 = vld [vmem:[%s115_s1] sm:$0xff]  ;;  %v15_v5 = vld [vmem:[%s117_s0 + $0x8] sm:$0xff] }
   0x3   :  { %v14_v4 = vld [vmem:[%s117_s0] sm:$0xff] }
   0x4   :  { %44 = vmatpush.msra.mxu0 %v18_v1  ;;  %64 = vmatpush.msra.mxu1 %v18_v1  ;;  %v67_v6 = vld [vmem:[%s116_s2] ss:$0 sm:$0xff] }
   0x6   :  { %45 = vmatpush.msra.mxu0 %v17_v2  ;;  %65 = vmatpush.msra.mxu1 %v17_v2 }
   0x8   :  { %46 = vmatpush.msra.mxu0 %v16_v3  ;;  %66 = vmatpush.msra.mxu1 %v16_v3 }
   0x9   :  { %61 = vmatmul.msk.f32.vlgmr.msra.gmra.mxu0 %vm24_vm0, %v14_v4  ;;  %62 = vmatmul.msk.f32.vlgmr.msra.gmra.mxu1 %vm24_vm0, %v15_v5 }
  0x86   :  { %v48_v7 = vpop.f32.mrf.mxu0  ;;  %v51_v8 = vpop.f32.mrf.mxu1 }
  0x87   :  { %v49_v9 = vadd.f32 %v67_v6, %v48_v7  ;;  %v52_v10 = vadd.f32 %v67_v6, %v51_v8 }
  0x89   :  { %55 = vst.msk [vmem:[%s118_s3] sm:$0xff] %vm54_vm1, %v49_v9 }
  0x8a   :  { %56 = vst.msk [vmem:[%s118_s3 + $0x8] sm:$0xff] %vm54_vm1, %v52_v10 }

// kernel: pallas_bert_encoder.11
= control target key start
LH: loop header
LB: loop body
LE: loop exit
PB: predicated region body
PF: predicated region fallthrough
CT: control target
= control target key end

     0   :  { %s582_s12 = smov 0   ;;  %s584_s13 = smov 0   ;;  %s650_s0 = inlined_call_operand.vmem [shape: f32[2,4,8,8], index: 0, kind: input, shape index: {}]   ;;  %s651_s1 = inlined_call_operand.vmem [shape: f32[2,4,8,8], index: 1, kind: input, shape index: {}]   ;;  %s652_s2 = inlined_call_operand.vmem [shape: f32[2,4,8,8], index: 2, kind: input, shape index: {}]   ;;  %s653_s3 = inlined_call_operand.vmem [shape: f32[2,4,8,8], index: 3, kind: output, shape index: {}]  }
   0x1   :  { %s586_s14 = smov 0   ;;  %s588_s15 = smov 0  }
   0x2   :  { %s590_s16 = smov 0  }
   0x3 LB: > { %s22_s17 = sadd.s32 1, %s552_s14  ;;  %s25_s18 = sadd.s32 1, %s556_s15  ;;  %s560_s16 = sphi %s590_s16, %s13_s16   ;;  %s556_s15 = sphi %s588_s15, %s657_s15   ;;  %s552_s14 = sphi %s586_s14, %s656_s14   ;;  %s548_s13 = sphi %s584_s13, %s655_s13   ;;  %s544_s12 = sphi %s582_s12, %s654_s12  }
   0x4   : > { %p23_p0 = scmp.ge.s32.totalorder %s22_s17, 4  ;;  %p465_p1 = scmp.ge.s32.totalorder %s560_s16, 1 }
   0x5   : > { %p186_p2 = scmp.lt.s32.totalorder %s560_s16, 9 }
   0x6   : > { %s659_s17 = smov (%p23_p0, %s22_s17), 0  ;;  %s661_s18 = smov (!%p23_p0, %s25_s18), %s556_s15 }
   0x7   : > { %p187_p3 = pnand %p465_p1, %p186_p2  ;;  %p27_p4 = scmp.ge.s32.totalorder %s661_s18, 2 }
   0x8   : > { %p232_p5 = scmp.lt.s32.totalorder (!%p187_p3), %s548_s13, 1  ;;  %p234_p6 = scmp.lt.s32.totalorder (!%p187_p3), %s544_s12, 3 }
   0x9   : > { %s663_s18 = smov (%p27_p4, %s661_s18), 0  ;;  %190 = sbr.rel (%p187_p3) target bundleno = 412 (0x19c), region = 32 }
   0xe   : > { %s665_s13 = smov (!%p232_p5, %s548_s13), 1  ;;  %s667_s12 = smov (!%p234_p6, %s544_s12), 3  ;;  %vm267_vm0 = vcmask 64512  }
   0xf   : > { %s466_s19 = sshll.u32 %s665_s13, 2 }
  0x10   : > { %s237_s20 = sadd.s32 %s466_s19, %s667_s12 }
  0x11   : > { %s612_s21 = sshll.u32 %s237_s20, 3 }
  0x12   : > { %s247_s24 = scalar_lea.vmem %s651_s1, %s612_s21  ;;  %s239_s27 = scalar_lea.vmem %s650_s0, %s612_s21 }
  0x13   : > { %v265_v0 = vld [vmem:[%s247_s24] sm:$0xff]  ;;  %s255_s30 = scalar_lea.vmem %s652_s2, %s612_s21  ;;  %s263_s6 = scalar_lea.vmem %s653_s3, %s612_s21 }
  0x14   : > { %v264_v1 = vld [vmem:[%s239_s27] sm:$0xff]  ;;  %286 = vmatpush.msra.mxu0 %v265_v0 }
  0x15   : > { %474 = vmatmul.msk.f32.vlgmr.msra.gmra.mxu0 %vm267_vm0, %v264_v1  ;;  %v266_v4 = vld [vmem:[%s255_s30] sm:$0xff] }
  0x16   : > { %318 = vmatpush.msra.mxu1 %v266_v4 }
  0x92   : > { %v288_v2 = vpop.f32.mrf.mxu0 }
  0x93   : > { %v291_v3 = vsel %vm267_vm0, %v288_v2, -inf }
  0x94   : > { %292 = vmax.xlane.f32.xlu0 %v291_v3 }
 0x107   : > { %v293_v5 = vpop.xlane.xlu0 %292 }
 0x108   : > { %v294_v6 = vsub.f32 %v288_v2, %v293_v5 }
 0x10a   : > { %v295_v7 = vmul.f32 1.442695, %v294_v6 }
 0x10c   : > { %518 = vpow2.f32 %v295_v7 }
 0x112   : > { %v519_v8 = vpop.eup %518 }
 0x113   : > { %475 = vmatmul.msk.f32.vlgmr.msra.gmra.mxu1 %vm267_vm0, %v519_v8  ;;  %v297_v9 = vsel %vm267_vm0, %v519_v8, 0.0 }
 0x114   : > { %298 = vadd.xlane.f32.xlu0 %v297_v9 }
 0x187   : > { %v299_v10 = vpop.xlane.xlu0 %298 }
 0x188   : > { %520 = vrcp.f32 %v299_v10  ;;  %v334_v14 = vand.u32 2147483648, %v299_v10  ;;  %v332_v16 = vand.u32 2147483647, %v299_v10  ;;  %vm328_vm2 = vweird.f32 %v299_v10 }
 0x18a   : > { %v335_v18 = vor.u32 1.1754944e-38, %v334_v14  ;;  %vm333_vm4 = vcmp.eq.f32.partialorder %v332_v16, 8.507059e+37 }
 0x18e   : > { %v521_v11 = vpop.eup %520 }
 0x18f   : > { %v324_v12 = vmul.f32 %v521_v11, %v299_v10  ;;  %vm329_vm1 = vweird.f32 %v521_v11 }
 0x190   : > { %vm330_vm3 = vmor %vm328_vm2, %vm329_vm1  ;;  %v320_v20 = vpop.f32.mrf.mxu1 }
 0x191   : > { %v325_v13 = vsub.f32 1.0, %v324_v12 }
 0x193   : > { %v326_v15 = vmul.f32 %v521_v11, %v325_v13 }
 0x195   : > { %v327_v17 = vadd.f32 %v521_v11, %v326_v15 }
 0x197   : > { %v331_v19 = vsel %vm330_vm3, %v521_v11, %v327_v17 }
 0x198   : > { %v336_v21 = vsel %vm333_vm4, %v335_v18, %v331_v19 }
 0x199   : > { %v337_v22 = vmul.f32 %v336_v21, %v320_v20 }
 0x19b   : > { %338 = vst.msk [vmem:[%s263_s6] sm:$0xff] %vm267_vm0, %v337_v22 }
 0x19c PF: > { %s13_s16 = sadd.s32 1, %s560_s16   ;;  %s654_s12 = smov %s552_s14 }
 0x19d   : > { %p10_p7 = scmp.ge.s32.totalorder %s13_s16, 10   ;;  %s655_s13 = smov %s556_s15 }
 0x19e   : > { %s656_s14 = smov %s659_s17  ;;  %s657_s15 = smov %s663_s18 }
 0x19f   :  { %12 = sbr.rel (!%p10_p7) target bundleno = 3 (0x3), region = 68 }

// kernel: pallas_bert_encoder.13
= control target key start
LH: loop header
LB: loop body
LE: loop exit
PB: predicated region body
PF: predicated region fallthrough
CT: control target
= control target key end

     0   :  { %vm24_vm0 = vcmask 261120   ;;  %s226_s1 = inlined_call_operand.vmem [shape: f32[32,128], index: 1, kind: input, shape index: {}]   ;;  %s227_s2 = inlined_call_operand.vmem [shape: f32[1,128], index: 2, kind: input, shape index: {}]   ;;  %s228_s0 = inlined_call_operand.vmem [shape: f32[16,32], index: 0, kind: input, shape index: {}]   ;;  %s229_s3 = inlined_call_operand.vmem [shape: f32[16,128], index: 3, kind: output, shape index: {}]  }
   0x1   :  { %v19_v0 = vld [vmem:[%s226_s1 + $0x18] sm:$0xff]  ;;  %v18_v1 = vld [vmem:[%s226_s1 + $0x10] sm:$0xff]  ;;  %v17_v2 = vld [vmem:[%s226_s1 + $0x8] sm:$0xff] }
   0x2   :  { %43 = vmatpush.msra.mxu0 %v19_v0  ;;  %152 = vmatpush.msra.mxu1 %v19_v0  ;;  %v16_v3 = vld [vmem:[%s226_s1] sm:$0xff]  ;;  %v15_v5 = vld [vmem:[%s228_s0 + $0x8] sm:$0xff] }
   0x3   :  { %v14_v4 = vld [vmem:[%s228_s0] sm:$0xff] }
   0x4   :  { %44 = vmatpush.msra.mxu0 %v18_v1  ;;  %153 = vmatpush.msra.mxu1 %v18_v1  ;;  %v156_v6 = vld [vmem:[%s227_s2] ss:$0 sm:$0xff] }
   0x6   :  { %45 = vmatpush.msra.mxu0 %v17_v2  ;;  %154 = vmatpush.msra.mxu1 %v17_v2 }
   0x8   :  { %46 = vmatpush.msra.mxu0 %v16_v3  ;;  %155 = vmatpush.msra.mxu1 %v16_v3 }
   0x9   :  { %148 = vmatmul.msk.f32.vlgmr.msra.gmra.mxu0 %vm24_vm0, %v14_v4  ;;  %149 = vmatmul.msk.f32.vlgmr.msra.gmra.mxu1 %vm24_vm0, %v15_v5 }
  0x86   :  { %v48_v7 = vpop.f32.mrf.mxu0  ;;  %v51_v8 = vpop.f32.mrf.mxu1 }
  0x87   :  { %v202_v9 = vadd.f32 %v156_v6, %v48_v7  ;;  %v204_v10 = vadd.f32 %v156_v6, %v51_v8 }
  0x89   :  { %v207_v11 = vmul.f32 0.70710677, %v202_v9  ;;  %v210_v12 = vmul.f32 0.70710677, %v204_v10 }
  0x8b   :  { %v58_v13 = vmul.f32 %v207_v11, %v207_v11  ;;  %v98_v14 = vmul.f32 %v210_v12, %v210_v12 }
  0x8d   :  { %v59_v15 = vmin.f32 %v58_v13, 16.0  ;;  %v99_v16 = vmin.f32 %v98_v14, 16.0 }
  0x8f   :  { %v60_v17 = vmul.f32 2.1237322e-06, %v59_v15  ;;  %v71_v18 = vmul.f32 3.8918573e-05, %v59_v15  ;;  %v100_v19 = vmul.f32 2.1237322e-06, %v99_v16 }
  0x90   :  { %v111_v20 = vmul.f32 3.8918573e-05, %v99_v16 }
  0x91   :  { %v61_v21 = vadd.f32 0.00028619796, %v60_v17  ;;  %v72_v22 = vadd.f32 0.001143296, %v71_v18  ;;  %v101_v23 = vadd.f32 0.00028619796, %v100_v19 }
  0x92   :  { %v112_v24 = vadd.f32 0.001143296, %v111_v20 }
  0x93   :  { %v62_v25 = vmul.f32 %v61_v21, %v59_v15  ;;  %v73_v26 = vmul.f32 %v72_v22, %v59_v15  ;;  %v102_v27 = vmul.f32 %v101_v23, %v99_v16  ;;  %v54_v23 = vmul.f32 0.5, %v202_v9 }
  0x94   :  { %v113_v28 = vmul.f32 %v112_v24, %v99_v16 }
  0x95   :  { %v63_v29 = vadd.f32 0.0036580483, %v62_v25  ;;  %v74_v30 = vadd.f32 0.014752088, %v73_v26  ;;  %v103_v33 = vadd.f32 0.0036580483, %v102_v27 }
  0x96   :  { %v114_v31 = vadd.f32 0.014752088, %v113_v28  ;;  %v55_v25 = vmul.f32 0.5, %v204_v10 }
  0x97   :  { %v75_v32 = vmul.f32 %v74_v30, %v59_v15  ;;  %v64_v35 = vmul.f32 %v63_v29, %v59_v15  ;;  %v104_v39 = vmul.f32 %v103_v33, %v99_v16 }
  0x98   :  { %v115_v34 = vmul.f32 %v114_v31, %v99_v16 }
  0x99   :  { %v76_v36 = vadd.f32 0.112945676, %v75_v32  ;;  %v65_v41 = vadd.f32 0.05243302, %v64_v35  ;;  %v105_v45 = vadd.f32 0.05243302, %v104_v39 }
  0x9a   :  { %v116_v37 = vadd.f32 0.112945676, %v115_v34 }
  0x9b   :  { %v77_v38 = vmul.f32 %v76_v36, %v59_v15  ;;  %v66_v47 = vmul.f32 %v65_v41, %v59_v15  ;;  %v106_v50 = vmul.f32 %v105_v45, %v99_v16 }
  0x9c   :  { %v117_v40 = vmul.f32 %v116_v37, %v99_v16 }
  0x9d   :  { %v78_v42 = vadd.f32 0.4994258, %v77_v38  ;;  %v67_v51 = vadd.f32 0.18741608, %v66_v47  ;;  %v107_v52 = vadd.f32 0.18741608, %v106_v50 }
  0x9e   :  { %v118_v43 = vadd.f32 0.4994258, %v117_v40 }
  0x9f   :  { %v79_v44 = vmul.f32 %v78_v42, %v59_v15  ;;  %v68_v54 = vmul.f32 %v67_v51, %v59_v15  ;;  %v108_v57 = vmul.f32 %v107_v52, %v99_v16 }
  0xa0   :  { %v119_v46 = vmul.f32 %v118_v43, %v99_v16 }
  0xa1   :  { %v80_v48 = vadd.f32 1.0, %v79_v44  ;;  %v69_v60 = vadd.f32 1.1283791, %v68_v54  ;;  %v109_v2 = vadd.f32 1.1283791, %v108_v57 }
  0xa2   :  { %v120_v49 = vadd.f32 1.0, %v119_v46 }
  0xa3   :  { %157 = vrcp.f32 %v80_v48  ;;  %v92_v61 = vand.u32 2147483648, %v80_v48  ;;  %v90_v0 = vand.u32 2147483647, %v80_v48  ;;  %vm86_vm3 = vweird.f32 %v80_v48 }
  0xa4   :  { %159 = vrcp.f32 %v120_v49  ;;  %v132_v1 = vand.u32 2147483648, %v120_v49  ;;  %v130_v4 = vand.u32 2147483647, %v120_v49  ;;  %vm126_vm5 = vweird.f32 %v120_v49 }
  0xa5   :  { %v93_v6 = vor.u32 1.1754944e-38, %v92_v61  ;;  %v70_v8 = vmul.f32 %v69_v60, %v207_v11  ;;  %vm91_vm6 = vcmp.eq.f32.partialorder %v90_v0, 8.507059e+37  ;;  %v110_v16 = vmul.f32 %v109_v2, %v210_v12 }
  0xa6   :  { %v133_v14 = vor.u32 1.1754944e-38, %v132_v1  ;;  %vm131_vm8 = vcmp.eq.f32.partialorder %v130_v4, 8.507059e+37 }
  0xa9   :  { %v158_v53 = vpop.eup %157 }
  0xaa   :  { %v160_v55 = vpop.eup %159  ;;  %v82_v56 = vmul.f32 %v158_v53, %v80_v48  ;;  %vm87_vm1 = vweird.f32 %v158_v53 }
  0xab   :  { %v122_v58 = vmul.f32 %v160_v55, %v120_v49  ;;  %vm127_vm2 = vweird.f32 %v160_v55  ;;  %vm88_vm4 = vmor %vm86_vm3, %vm87_vm1 }
  0xac   :  { %v83_v59 = vsub.f32 1.0, %v82_v56  ;;  %vm128_vm7 = vmor %vm126_vm5, %vm127_vm2 }
  0xad   :  { %v123_v62 = vsub.f32 1.0, %v122_v58 }
  0xae   :  { %v84_v63 = vmul.f32 %v158_v53, %v83_v59 }
  0xaf   :  { %v124_v3 = vmul.f32 %v160_v55, %v123_v62 }
  0xb0   :  { %v85_v5 = vadd.f32 %v158_v53, %v84_v63 }
  0xb1   :  { %v125_v7 = vadd.f32 %v160_v55, %v124_v3 }
  0xb2   :  { %v89_v13 = vsel %vm88_vm4, %v158_v53, %v85_v5 }
  0xb3   :  { %v94_v15 = vsel %vm91_vm6, %v93_v6, %v89_v13  ;;  %v129_v17 = vsel %vm128_vm7, %v160_v55, %v125_v7 }
  0xb4   :  { %v95_v18 = vmul.f32 %v94_v15, %v70_v8  ;;  %v134_v19 = vsel %vm131_vm8, %v133_v14, %v129_v17 }
  0xb5   :  { %v135_v20 = vmul.f32 %v134_v19, %v110_v16 }
  0xb6   :  { %v150_v21 = vclamps-f32 %v95_v18, 1.0 }
  0xb7   :  { %v151_v22 = vclamps-f32 %v135_v20, 1.0 }
  0xb8   :  { %v138_v24 = vadd.f32 1.0, %v150_v21 }
  0xb9   :  { %v139_v11 = vadd.f32 1.0, %v151_v22 }
  0xba   :  { %v140_v26 = vmul.f32 %v138_v24, %v54_v23 }
  0xbb   :  { %v141_v27 = vmul.f32 %v139_v11, %v55_v25 }
  0xbc   :  { %142 = vst [vmem:[%s229_s3] sm:$0xff] %v140_v26 }
  0xbd   :  { %143 = vst [vmem:[%s229_s3 + $0x8] sm:$0xff] %v141_v27 }

// kernel: pallas_bert_encoder.12
= control target key start
LH: loop header
LB: loop body
LE: loop exit
PB: predicated region body
PF: predicated region fallthrough
CT: control target
= control target key end

     0   :  { %vm33_vm0 = vcmask 261120   ;;  %v152_v17 = vmov 32.0   ;;  %s235_s1 = inlined_call_operand.vmem [shape: f32[32,32], index: 1, kind: input, shape index: {}]   ;;  %s236_s2 = inlined_call_operand.vmem [shape: f32[1,32], index: 2, kind: input, shape index: {}]   ;;  %s237_s0 = inlined_call_operand.vmem [shape: f32[16,32], index: 0, kind: input, shape index: {}]   ;;  %s238_s3 = inlined_call_operand.vmem [shape: f32[16,32], index: 3, kind: input, shape index: {}]   ;;  %s239_s4 = inlined_call_operand.vmem [shape: f32[1,32], index: 4, kind: input, shape index: {}]   ;;  %s240_s5 = inlined_call_operand.vmem [shape: f32[1,32], index: 5, kind: input, shape index: {}]   ;;  %s241_s6 = inlined_call_operand.vmem [shape: f32[16,32], index: 6, kind: output, shape index: {}]  }
   0x1   :  { %v28_v0 = vld [vmem:[%s235_s1 + $0x18] sm:$0xff]  ;;  %v27_v1 = vld [vmem:[%s235_s1 + $0x10] sm:$0xff]  ;;  %v26_v2 = vld [vmem:[%s235_s1 + $0x8] sm:$0xff]  ;;  %146 = vrcp.f32 %v152_v17 }
   0x2   :  { %52 = vmatpush.msra.mxu0 %v28_v0  ;;  %138 = vmatpush.msra.mxu1 %v28_v0  ;;  %v25_v3 = vld [vmem:[%s235_s1] sm:$0xff]  ;;  %v24_v5 = vld [vmem:[%s237_s0 + $0x8] sm:$0xff] }
   0x3   :  { %v23_v4 = vld [vmem:[%s237_s0] sm:$0xff]  ;;  %v64_v13 = vld [vmem:[%s238_s3 + $0x8] sm:$0xff] }
   0x4   :  { %53 = vmatpush.msra.mxu0 %v27_v1  ;;  %139 = vmatpush.msra.mxu1 %v27_v1  ;;  %v143_v6 = vld [vmem:[%s236_s2] ss:$0 sm:$0xff] }
   0x5   :  { %v63_v8 = vld [vmem:[%s238_s3] sm:$0xff] }
   0x6   :  { %54 = vmatpush.msra.mxu0 %v26_v2  ;;  %140 = vmatpush.msra.mxu1 %v26_v2  ;;  %v144_v48 = vld [vmem:[%s239_s4] ss:$0 sm:$0xff] }
   0x7   :  { %v147_v18 = vpop.eup %146  ;;  %v145_v51 = vld [vmem:[%s240_s5] ss:$0 sm:$0xff] }
   0x8   :  { %55 = vmatpush.msra.mxu0 %v25_v3  ;;  %141 = vmatpush.msra.mxu1 %v25_v3  ;;  %v74_v19 = vmul.f32 32.0, %v147_v18  ;;  %vm78_vm1 = vweird.f32 %v147_v18 }
   0x9   :  { %136 = vmatmul.msk.f32.vlgmr.msra.gmra.mxu0 %vm33_vm0, %v23_v4  ;;  %137 = vmatmul.msk.f32.vlgmr.msra.gmra.mxu1 %vm33_vm0, %v24_v5 }
   0xa   :  { %v75_v20 = vsub.f32 1.0, %v74_v19 }
   0xc   :  { %v76_v21 = vmul.f32 %v147_v18, %v75_v20 }
   0xe   :  { %v77_v22 = vadd.f32 %v147_v18, %v76_v21 }
  0x10   :  { %v79_v23 = vsel %vm78_vm1, %v147_v18, %v77_v22 }
  0x86   :  { %v57_v7 = vpop.f32.mrf.mxu0  ;;  %v60_v9 = vpop.f32.mrf.mxu1 }
  0x87   :  { %v58_v10 = vadd.f32 %v143_v6, %v57_v7  ;;  %v61_v12 = vadd.f32 %v143_v6, %v60_v9 }
  0x89   :  { %v65_v11 = vadd.f32 %v63_v8, %v58_v10  ;;  %v66_v15 = vadd.f32 %v64_v13, %v61_v12 }
  0x8b   :  { %v67_v14 = vsel %vm33_vm0, %v65_v11, 0.0  ;;  %v70_v16 = vsel %vm33_vm0, %v66_v15, 0.0 }
  0x8c   :  { %68 = vadd.xlane.f32.xlu0 %v67_v14 }
  0x94   :  { %71 = vadd.xlane.f32.xlu0 %v70_v16 }
  0xff   :  { %v69_v24 = vpop.xlane.xlu0 %68 }
 0x100   :  { %v80_v25 = vmul.f32 %v79_v23, %v69_v24 }
 0x102   :  { %v82_v26 = vsub.f32 %v65_v11, %v80_v25 }
 0x104   :  { %v84_v27 = vmul.f32 %v82_v26, %v82_v26 }
 0x106   :  { %v86_v28 = vsel %vm33_vm0, %v84_v27, 0.0 }
 0x107   :  { %87 = vadd.xlane.f32.xlu1 %v86_v28  ;;  %v72_v29 = vpop.xlane.xlu0 %71 }
 0x108   :  { %v81_v30 = vmul.f32 %v79_v23, %v72_v29 }
 0x10a   :  { %v83_v31 = vsub.f32 %v66_v15, %v81_v30 }
 0x10c   :  { %v85_v32 = vmul.f32 %v83_v31, %v83_v31 }
 0x10e   :  { %v89_v33 = vsel %vm33_vm0, %v85_v32, 0.0 }
 0x10f   :  { %90 = vadd.xlane.f32.xlu1 %v89_v33 }
 0x17a   :  { %v88_v34 = vpop.xlane.xlu1 %87 }
 0x17b   :  { %v92_v35 = vmul.f32 %v88_v34, %v79_v23 }
 0x17d   :  { %v94_v36 = vadd.f32 1e-12, %v92_v35 }
 0x17f   :  { %148 = vrsqrt.f32 %v94_v36  ;;  %vm102_vm3 = vweird.f32 %v94_v36 }
 0x182   :  { %v91_v37 = vpop.xlane.xlu1 %90 }
 0x183   :  { %v93_v38 = vmul.f32 %v91_v37, %v79_v23 }
 0x185   :  { %v149_v39 = vpop.eup %148  ;;  %v95_v40 = vadd.f32 1e-12, %v93_v38 }
 0x186   :  { %v97_v41 = vmul.f32 %v149_v39, %v94_v36  ;;  %vm103_vm2 = vweird.f32 %v149_v39 }
 0x187   :  { %150 = vrsqrt.f32 %v95_v40  ;;  %vm104_vm4 = vmor %vm102_vm3, %vm103_vm2  ;;  %vm112_vm6 = vweird.f32 %v95_v40 }
 0x188   :  { %v98_v42 = vmul.f32 %v149_v39, %v97_v41 }
 0x18a   :  { %v99_v43 = vmul.f32 0.5, %v98_v42 }
 0x18c   :  { %v100_v44 = vsub.f32 1.5, %v99_v43 }
 0x18d   :  { %v151_v45 = vpop.eup %150 }
 0x18e   :  { %v101_v46 = vmul.f32 %v149_v39, %v100_v44  ;;  %v107_v47 = vmul.f32 %v151_v45, %v95_v40  ;;  %vm113_vm5 = vweird.f32 %v151_v45 }
 0x18f   :  { %vm114_vm7 = vmor %vm112_vm6, %vm113_vm5 }
 0x190   :  { %v105_v49 = vsel %vm104_vm4, %v149_v39, %v101_v46  ;;  %v108_v50 = vmul.f32 %v151_v45, %v107_v47 }
 0x191   :  { %v116_v52 = vmul.f32 %v105_v49, %v82_v26 }
 0x192   :  { %v109_v53 = vmul.f32 0.5, %v108_v50 }
 0x193   :  { %v122_v54 = vmul.f32 %v144_v48, %v116_v52 }
 0x194   :  { %v110_v55 = vsub.f32 1.5, %v109_v53 }
 0x195   :  { %v128_v56 = vadd.f32 %v145_v51, %v122_v54 }
 0x196   :  { %v111_v57 = vmul.f32 %v151_v45, %v110_v55 }
 0x197   :  { %130 = vst.msk [vmem:[%s241_s6] sm:$0xff] %vm33_vm0, %v128_v56 }
 0x198   :  { %v115_v58 = vsel %vm114_vm7, %v151_v45, %v111_v57 }
 0x199   :  { %v117_v59 = vmul.f32 %v115_v58, %v83_v31 }
 0x19b   :  { %v123_v60 = vmul.f32 %v144_v48, %v117_v59 }
 0x19d   :  { %v129_v61 = vadd.f32 %v145_v51, %v123_v60 }
 0x19f   :  { %131 = vst.msk [vmem:[%s241_s6 + $0x8] sm:$0xff] %vm33_vm0, %v129_v61 }

// kernel: pallas_bert_encoder.14
= control target key start
LH: loop header
LB: loop body
LE: loop exit
PB: predicated region body
PF: predicated region fallthrough
CT: control target
= control target key end

     0   :  { %vm72_vm0 = vcmask 261120   ;;  %v168_v29 = vmov 32.0   ;;  %s285_s1 = inlined_call_operand.vmem [shape: f32[128,32], index: 1, kind: input, shape index: {}]   ;;  %s286_s2 = inlined_call_operand.vmem [shape: f32[1,32], index: 2, kind: input, shape index: {}]   ;;  %s287_s0 = inlined_call_operand.vmem [shape: f32[16,128], index: 0, kind: input, shape index: {}]   ;;  %s288_s3 = inlined_call_operand.vmem [shape: f32[16,32], index: 3, kind: input, shape index: {}]   ;;  %s289_s4 = inlined_call_operand.vmem [shape: f32[1,32], index: 4, kind: input, shape index: {}]   ;;  %s290_s5 = inlined_call_operand.vmem [shape: f32[1,32], index: 5, kind: input, shape index: {}]   ;;  %s291_s6 = inlined_call_operand.vmem [shape: f32[16,32], index: 6, kind: output, shape index: {}]  }
   0x1   :  { %v40_v0 = vld [vmem:[%s285_s1 + $0x78] sm:$0xff]  ;;  %v39_v1 = vld [vmem:[%s285_s1 + $0x70] sm:$0xff]  ;;  %v38_v2 = vld [vmem:[%s285_s1 + $0x68] sm:$0xff]  ;;  %162 = vrcp.f32 %v168_v29 }
   0x2   :  { %45 = vmatpush.msra.mxu0 %v40_v0  ;;  %142 = vmatpush.msra.mxu1 %v40_v0  ;;  %v37_v3 = vld [vmem:[%s285_s1 + $0x60] sm:$0xff]  ;;  %v36_v4 = vld [vmem:[%s285_s1 + $0x58] sm:$0xff]  ;;  %v35_v5 = vld [vmem:[%s285_s1 + $0x50] sm:$0xff] }
   0x3   :  { %v34_v6 = vld [vmem:[%s285_s1 + $0x48] sm:$0xff]  ;;  %v33_v7 = vld [vmem:[%s285_s1 + $0x40] sm:$0xff]  ;;  %v32_v8 = vld [vmem:[%s285_s1 + $0x38] sm:$0xff] }
   0x4   :  { %46 = vmatpush.msra.mxu0 %v39_v1  ;;  %143 = vmatpush.msra.mxu1 %v39_v1  ;;  %v31_v9 = vld [vmem:[%s285_s1 + $0x30] sm:$0xff]  ;;  %v30_v10 = vld [vmem:[%s285_s1 + $0x28] sm:$0xff]  ;;  %v29_v11 = vld [vmem:[%s285_s1 + $0x20] sm:$0xff] }
   0x5   :  { %v28_v12 = vld [vmem:[%s285_s1 + $0x18] sm:$0xff]  ;;  %v27_v13 = vld [vmem:[%s285_s1 + $0x10] sm:$0xff]  ;;  %v26_v14 = vld [vmem:[%s285_s1 + $0x8] sm:$0xff] }
   0x6   :  { %47 = vmatpush.msra.mxu0 %v38_v2  ;;  %144 = vmatpush.msra.mxu1 %v38_v2  ;;  %v25_v15 = vld [vmem:[%s285_s1] sm:$0xff]  ;;  %v24_v17 = vld [vmem:[%s287_s0 + $0x8] sm:$0xff] }
   0x7   :  { %v23_v16 = vld [vmem:[%s287_s0] sm:$0xff]  ;;  %v69_v25 = vld [vmem:[%s288_s3 + $0x8] sm:$0xff]  ;;  %v163_v30 = vpop.eup %162 }
   0x8   :  { %48 = vmatpush.msra.mxu0 %v37_v3  ;;  %145 = vmatpush.msra.mxu1 %v37_v3  ;;  %v159_v18 = vld [vmem:[%s286_s2] ss:$0 sm:$0xff]  ;;  %v80_v31 = vmul.f32 32.0, %v163_v30  ;;  %vm84_vm1 = vweird.f32 %v163_v30 }
   0x9   :  { %v68_v20 = vld [vmem:[%s288_s3] sm:$0xff] }
   0xa   :  { %49 = vmatpush.msra.mxu0 %v36_v4  ;;  %146 = vmatpush.msra.mxu1 %v36_v4  ;;  %v81_v32 = vsub.f32 1.0, %v80_v31  ;;  %v160_v60 = vld [vmem:[%s289_s4] ss:$0 sm:$0xff] }
   0xb   :  { %v161_v63 = vld [vmem:[%s290_s5] ss:$0 sm:$0xff] }
   0xc   :  { %50 = vmatpush.msra.mxu0 %v35_v5  ;;  %147 = vmatpush.msra.mxu1 %v35_v5  ;;  %v82_v33 = vmul.f32 %v163_v30, %v81_v32 }
   0xe   :  { %51 = vmatpush.msra.mxu0 %v34_v6  ;;  %148 = vmatpush.msra.mxu1 %v34_v6  ;;  %v83_v34 = vadd.f32 %v163_v30, %v82_v33 }
  0x10   :  { %52 = vmatpush.msra.mxu0 %v33_v7  ;;  %149 = vmatpush.msra.mxu1 %v33_v7  ;;  %v85_v35 = vsel %vm84_vm1, %v163_v30, %v83_v34 }
  0x12   :  { %53 = vmatpush.msra.mxu0 %v32_v8  ;;  %150 = vmatpush.msra.mxu1 %v32_v8 }
  0x14   :  { %54 = vmatpush.msra.mxu0 %v31_v9  ;;  %151 = vmatpush.msra.mxu1 %v31_v9 }
  0x16   :  { %55 = vmatpush.msra.mxu0 %v30_v10  ;;  %152 = vmatpush.msra.mxu1 %v30_v10 }
  0x18   :  { %56 = vmatpush.msra.mxu0 %v29_v11  ;;  %153 = vmatpush.msra.mxu1 %v29_v11 }
  0x1a   :  { %57 = vmatpush.msra.mxu0 %v28_v12  ;;  %154 = vmatpush.msra.mxu1 %v28_v12 }
  0x1c   :  { %58 = vmatpush.msra.mxu0 %v27_v13  ;;  %155 = vmatpush.msra.mxu1 %v27_v13 }
  0x1e   :  { %59 = vmatpush.msra.mxu0 %v26_v14  ;;  %156 = vmatpush.msra.mxu1 %v26_v14 }
  0x20   :  { %60 = vmatpush.msra.mxu0 %v25_v15  ;;  %157 = vmatpush.msra.mxu1 %v25_v15 }
  0x21   :  { %61 = vmatmul.f32.vlgmr.msra.gmra.mxu0 %v23_v16  ;;  %64 = vmatmul.f32.vlgmr.msra.gmra.mxu1 %v24_v17 }
  0x9e   :  { %v62_v19 = vpop.f32.mrf.mxu0  ;;  %v65_v21 = vpop.f32.mrf.mxu1 }
  0x9f   :  { %v63_v22 = vadd.f32 %v159_v18, %v62_v19  ;;  %v66_v24 = vadd.f32 %v159_v18, %v65_v21 }
  0xa1   :  { %v70_v23 = vadd.f32 %v68_v20, %v63_v22  ;;  %v71_v27 = vadd.f32 %v69_v25, %v66_v24 }
  0xa3   :  { %v73_v26 = vsel %vm72_vm0, %v70_v23, 0.0  ;;  %v76_v28 = vsel %vm72_vm0, %v71_v27, 0.0 }
  0xa4   :  { %74 = vadd.xlane.f32.xlu0 %v73_v26 }
  0xac   :  { %77 = vadd.xlane.f32.xlu0 %v76_v28 }
 0x117   :  { %v75_v36 = vpop.xlane.xlu0 %74 }
 0x118   :  { %v86_v37 = vmul.f32 %v85_v35, %v75_v36 }
 0x11a   :  { %v88_v38 = vsub.f32 %v70_v23, %v86_v37 }
 0x11c   :  { %v90_v39 = vmul.f32 %v88_v38, %v88_v38 }
 0x11e   :  { %v92_v40 = vsel %vm72_vm0, %v90_v39, 0.0 }
 0x11f   :  { %93 = vadd.xlane.f32.xlu1 %v92_v40  ;;  %v78_v41 = vpop.xlane.xlu0 %77 }
 0x120   :  { %v87_v42 = vmul.f32 %v85_v35, %v78_v41 }
 0x122   :  { %v89_v43 = vsub.f32 %v71_v27, %v87_v42 }
 0x124   :  { %v91_v44 = vmul.f32 %v89_v43, %v89_v43 }
 0x126   :  { %v95_v45 = vsel %vm72_vm0, %v91_v44, 0.0 }
 0x127   :  { %96 = vadd.xlane.f32.xlu1 %v95_v45 }
 0x192   :  { %v94_v46 = vpop.xlane.xlu1 %93 }
 0x193   :  { %v98_v47 = vmul.f32 %v94_v46, %v85_v35 }
 0x195   :  { %v100_v48 = vadd.f32 1e-12, %v98_v47 }
 0x197   :  { %164 = vrsqrt.f32 %v100_v48  ;;  %vm108_vm3 = vweird.f32 %v100_v48 }
 0x19a   :  { %v97_v49 = vpop.xlane.xlu1 %96 }
 0x19b   :  { %v99_v50 = vmul.f32 %v97_v49, %v85_v35 }
 0x19d   :  { %v165_v51 = vpop.eup %164  ;;  %v101_v52 = vadd.f32 1e-12, %v99_v50 }
 0x19e   :  { %v103_v53 = vmul.f32 %v165_v51, %v100_v48  ;;  %vm109_vm2 = vweird.f32 %v165_v51 }
 0x19f   :  { %166 = vrsqrt.f32 %v101_v52  ;;  %vm110_vm4 = vmor %vm108_vm3, %vm109_vm2  ;;  %vm118_vm6 = vweird.f32 %v101_v52 }
 0x1a0   :  { %v104_v54 = vmul.f32 %v165_v51, %v103_v53 }
 0x1a2   :  { %v105_v55 = vmul.f32 0.5, %v104_v54 }
 0x1a4   :  { %v106_v56 = vsub.f32 1.5, %v105_v55 }
 0x1a5   :  { %v167_v57 = vpop.eup %166 }
 0x1a6   :  { %v107_v58 = vmul.f32 %v165_v51, %v106_v56  ;;  %v113_v59 = vmul.f32 %v167_v57, %v101_v52  ;;  %vm119_vm5 = vweird.f32 %v167_v57 }
 0x1a7   :  { %vm120_vm7 = vmor %vm118_vm6, %vm119_vm5 }
 0x1a8   :  { %v111_v61 = vsel %vm110_vm4, %v165_v51, %v107_v58  ;;  %v114_v62 = vmul.f32 %v167_v57, %v113_v59 }
 0x1a9   :  { %v122_v0 = vmul.f32 %v111_v61, %v88_v38 }
 0x1aa   :  { %v115_v1 = vmul.f32 0.5, %v114_v62 }
 0x1ab   :  { %v128_v2 = vmul.f32 %v160_v60, %v122_v0 }
 0x1ac   :  { %v116_v3 = vsub.f32 1.5, %v115_v1 }
 0x1ad   :  { %v134_v4 = vadd.f32 %v161_v63, %v128_v2 }
 0x1ae   :  { %v117_v5 = vmul.f32 %v167_v57, %v116_v3 }
 0x1af   :  { %136 = vst.msk [vmem:[%s291_s6] sm:$0xff] %vm72_vm0, %v134_v4 }
 0x1b0   :  { %v121_v6 = vsel %vm120_vm7, %v167_v57, %v117_v5 }
 0x1b1   :  { %v123_v7 = vmul.f32 %v121_v6, %v89_v43 }
 0x1b3   :  { %v129_v8 = vmul.f32 %v160_v60, %v123_v7 }
 0x1b5   :  { %v135_v9 = vadd.f32 %v161_v63, %v129_v8 }
 0x1b7   :  { %137 = vst.msk [vmem:[%s291_s6 + $0x8] sm:$0xff] %vm72_vm0, %v135_v9 }

// kernel: pallas_bert_encoder.19
= control target key start
LH: loop header
LB: loop body
LE: loop exit
PB: predicated region body
PF: predicated region fallthrough
CT: control target
= control target key end

     0   :  { %s329_s0 = inlined_call_operand.vmem [shape: f32[16,128], index: 0, kind: input, shape index: {}]   ;;  %s330_s1 = inlined_call_operand.vmem [shape: f32[128,32], index: 1, kind: input, shape index: {}]   ;;  %s331_s2 = inlined_call_operand.vmem [shape: f32[1,32], index: 2, kind: input, shape index: {}]   ;;  %s332_s3 = inlined_call_operand.vmem [shape: f32[16,32], index: 3, kind: input, shape index: {}]   ;;  %s333_s4 = inlined_call_operand.vmem [shape: f32[1,32], index: 4, kind: input, shape index: {}]   ;;  %s334_s5 = inlined_call_operand.vmem [shape: f32[1,32], index: 5, kind: input, shape index: {}]   ;;  %s335_s6 = inlined_call_operand.hbm [shape: f32[16,32], index: 6, kind: output, shape index: {}]  }
   0x1   :  { %v41_v0 = vld [vmem:[%s330_s1 + $0x78] sm:$0xff]  ;;  %v40_v1 = vld [vmem:[%s330_s1 + $0x70] sm:$0xff]  ;;  %v39_v2 = vld [vmem:[%s330_s1 + $0x68] sm:$0xff] }
   0x2   :  { %46 = vmatpush.msra.mxu0 %v41_v0  ;;  %157 = vmatpush.msra.mxu1 %v41_v0  ;;  %v38_v3 = vld [vmem:[%s330_s1 + $0x60] sm:$0xff]  ;;  %v37_v4 = vld [vmem:[%s330_s1 + $0x58] sm:$0xff] }
   0x4   :  { %47 = vmatpush.msra.mxu0 %v40_v1  ;;  %158 = vmatpush.msra.mxu1 %v40_v1 }
   0x6   :  { %48 = vmatpush.msra.mxu0 %v39_v2  ;;  %159 = vmatpush.msra.mxu1 %v39_v2 }
   0x8   :  { %49 = vmatpush.msra.mxu0 %v38_v3  ;;  %160 = vmatpush.msra.mxu1 %v38_v3 }
   0x9   :  { %11 = vsyncpa [#allocation3], 0  ;;  %v36_v5 = vld [vmem:[%s330_s1 + $0x50] sm:$0xff]  ;;  %v35_v6 = vld [vmem:[%s330_s1 + $0x48] sm:$0xff]  ;;  %vm73_vm0 = vcmask 261120   ;;  %v212_v29 = vmov 32.0  }
   0xa   :  { %50 = vmatpush.msra.mxu0 %v37_v4  ;;  %161 = vmatpush.msra.mxu1 %v37_v4  ;;  %v34_v7 = vld [vmem:[%s330_s1 + $0x40] sm:$0xff]  ;;  %v33_v8 = vld [vmem:[%s330_s1 + $0x38] sm:$0xff]  ;;  %v32_v9 = vld [vmem:[%s330_s1 + $0x30] sm:$0xff]  ;;  %180 = vrcp.f32 %v212_v29  ;;  %s145_s18 = sshll.u32 %s335_s6, 4  ;;  %s215_s19 = smov 8   ;;  %s146_s18 = int_to_ptr.hbm [resolvable:$true] %s145_s18 }
   0xb   :  { %v31_v10 = vld [vmem:[%s330_s1 + $0x28] sm:$0xff]  ;;  %v30_v11 = vld [vmem:[%s330_s1 + $0x20] sm:$0xff]  ;;  %v29_v12 = vld [vmem:[%s330_s1 + $0x18] sm:$0xff] }
   0xc   :  { %51 = vmatpush.msra.mxu0 %v36_v5  ;;  %162 = vmatpush.msra.mxu1 %v36_v5  ;;  %v28_v13 = vld [vmem:[%s330_s1 + $0x10] sm:$0xff]  ;;  %v27_v14 = vld [vmem:[%s330_s1 + $0x8] sm:$0xff]  ;;  %v26_v15 = vld [vmem:[%s330_s1] sm:$0xff] }
   0xd   :  { %v24_v16 = vld [vmem:[%s329_s0] sm:$0xff]  ;;  %v25_v17 = vld [vmem:[%s329_s0 + $0x8] sm:$0xff] }
   0xe   :  { %52 = vmatpush.msra.mxu0 %v35_v6  ;;  %163 = vmatpush.msra.mxu1 %v35_v6  ;;  %v177_v18 = vld [vmem:[%s331_s2] ss:$0 sm:$0xff]  ;;  %v70_v25 = vld [vmem:[%s332_s3 + $0x8] sm:$0xff] }
   0xf   :  { %v69_v20 = vld [vmem:[%s332_s3] sm:$0xff] }
  0x10   :  { %53 = vmatpush.msra.mxu0 %v34_v7  ;;  %164 = vmatpush.msra.mxu1 %v34_v7  ;;  %v181_v30 = vpop.eup %180  ;;  %v178_v60 = vld [vmem:[%s333_s4] ss:$0 sm:$0xff]  ;;  %s213_s4 = smov [#allocation2]  }
  0x11   :  { %v81_v31 = vmul.f32 32.0, %v181_v30  ;;  %vm85_vm1 = vweird.f32 %v181_v30  ;;  %v179_v0 = vld [vmem:[%s334_s5] ss:$0 sm:$0xff]  ;;  %s143_s15 = sshll.u32 %s213_s4, 4  ;;  %s214_s5 = smov 128   ;;  %s144_s15 = int_to_ptr.vmem [resolvable:$true] %s143_s15 }
  0x12   :  { %54 = vmatpush.msra.mxu0 %v33_v8  ;;  %165 = vmatpush.msra.mxu1 %v33_v8 }
  0x13   :  { %v82_v32 = vsub.f32 1.0, %v81_v31 }
  0x14   :  { %55 = vmatpush.msra.mxu0 %v32_v9  ;;  %166 = vmatpush.msra.mxu1 %v32_v9 }
  0x15   :  { %v83_v33 = vmul.f32 %v181_v30, %v82_v32 }
  0x16   :  { %56 = vmatpush.msra.mxu0 %v31_v10  ;;  %167 = vmatpush.msra.mxu1 %v31_v10 }
  0x17   :  { %v84_v34 = vadd.f32 %v181_v30, %v83_v33 }
  0x18   :  { %57 = vmatpush.msra.mxu0 %v30_v11  ;;  %168 = vmatpush.msra.mxu1 %v30_v11 }
  0x19   :  { %v86_v35 = vsel %vm85_vm1, %v181_v30, %v84_v34 }
  0x1a   :  { %58 = vmatpush.msra.mxu0 %v29_v12  ;;  %169 = vmatpush.msra.mxu1 %v29_v12 }
  0x1c   :  { %59 = vmatpush.msra.mxu0 %v28_v13  ;;  %170 = vmatpush.msra.mxu1 %v28_v13 }
  0x1e   :  { %60 = vmatpush.msra.mxu0 %v27_v14  ;;  %171 = vmatpush.msra.mxu1 %v27_v14 }
  0x20   :  { %61 = vmatpush.msra.mxu0 %v26_v15  ;;  %172 = vmatpush.msra.mxu1 %v26_v15 }
  0x21   :  { %62 = vmatmul.f32.vlgmr.msra.gmra.mxu0 %v24_v16  ;;  %65 = vmatmul.f32.vlgmr.msra.gmra.mxu1 %v25_v17 }
  0x9e   :  { %v63_v19 = vpop.f32.mrf.mxu0  ;;  %v66_v21 = vpop.f32.mrf.mxu1 }
  0x9f   :  { %v64_v22 = vadd.f32 %v177_v18, %v63_v19  ;;  %v67_v24 = vadd.f32 %v177_v18, %v66_v21 }
  0xa1   :  { %v71_v23 = vadd.f32 %v69_v20, %v64_v22  ;;  %v72_v27 = vadd.f32 %v70_v25, %v67_v24 }
  0xa3   :  { %v74_v26 = vsel %vm73_vm0, %v71_v23, 0.0  ;;  %v77_v28 = vsel %vm73_vm0, %v72_v27, 0.0 }
  0xa4   :  { %75 = vadd.xlane.f32.xlu0 %v74_v26 }
  0xac   :  { %78 = vadd.xlane.f32.xlu0 %v77_v28 }
 0x117   :  { %v76_v36 = vpop.xlane.xlu0 %75 }
 0x118   :  { %v87_v37 = vmul.f32 %v86_v35, %v76_v36 }
 0x11a   :  { %v89_v38 = vsub.f32 %v71_v23, %v87_v37 }
 0x11c   :  { %v91_v39 = vmul.f32 %v89_v38, %v89_v38 }
 0x11e   :  { %v93_v40 = vsel %vm73_vm0, %v91_v39, 0.0 }
 0x11f   :  { %94 = vadd.xlane.f32.xlu1 %v93_v40  ;;  %v79_v41 = vpop.xlane.xlu0 %78 }
 0x120   :  { %v88_v42 = vmul.f32 %v86_v35, %v79_v41 }
 0x122   :  { %v90_v43 = vsub.f32 %v72_v27, %v88_v42 }
 0x124   :  { %v92_v44 = vmul.f32 %v90_v43, %v90_v43 }
 0x126   :  { %v96_v45 = vsel %vm73_vm0, %v92_v44, 0.0 }
 0x127   :  { %97 = vadd.xlane.f32.xlu1 %v96_v45 }
 0x192   :  { %v95_v46 = vpop.xlane.xlu1 %94 }
 0x193   :  { %v99_v47 = vmul.f32 %v95_v46, %v86_v35 }
 0x195   :  { %v101_v48 = vadd.f32 1e-12, %v99_v47 }
 0x197   :  { %182 = vrsqrt.f32 %v101_v48  ;;  %vm109_vm3 = vweird.f32 %v101_v48 }
 0x19a   :  { %v98_v49 = vpop.xlane.xlu1 %97 }
 0x19b   :  { %v100_v50 = vmul.f32 %v98_v49, %v86_v35 }
 0x19d   :  { %v183_v51 = vpop.eup %182  ;;  %v102_v52 = vadd.f32 1e-12, %v100_v50 }
 0x19e   :  { %v104_v53 = vmul.f32 %v183_v51, %v101_v48  ;;  %vm110_vm2 = vweird.f32 %v183_v51 }
 0x19f   :  { %184 = vrsqrt.f32 %v102_v52  ;;  %vm111_vm4 = vmor %vm109_vm3, %vm110_vm2  ;;  %vm119_vm6 = vweird.f32 %v102_v52 }
 0x1a0   :  { %v105_v54 = vmul.f32 %v183_v51, %v104_v53 }
 0x1a2   :  { %v106_v55 = vmul.f32 0.5, %v105_v54 }
 0x1a4   :  { %v107_v56 = vsub.f32 1.5, %v106_v55 }
 0x1a5   :  { %v185_v57 = vpop.eup %184 }
 0x1a6   :  { %v108_v58 = vmul.f32 %v183_v51, %v107_v56  ;;  %v114_v59 = vmul.f32 %v185_v57, %v102_v52  ;;  %vm120_vm5 = vweird.f32 %v185_v57 }
 0x1a7   :  { %vm121_vm7 = vmor %vm119_vm6, %vm120_vm5 }
 0x1a8   :  { %v112_v61 = vsel %vm111_vm4, %v183_v51, %v108_v58  ;;  %v115_v62 = vmul.f32 %v185_v57, %v114_v59 }
 0x1a9   :  { %v123_v63 = vmul.f32 %v112_v61, %v89_v38 }
 0x1aa   :  { %v116_v1 = vmul.f32 0.5, %v115_v62 }
 0x1ab   :  { %v129_v2 = vmul.f32 %v178_v60, %v123_v63 }
 0x1ac   :  { %v117_v3 = vsub.f32 1.5, %v116_v1 }
 0x1ad   :  { %v135_v4 = vadd.f32 %v179_v0, %v129_v2 }
 0x1ae   :  { %v118_v5 = vmul.f32 %v185_v57, %v117_v3 }
 0x1af   :  { %137 = vst.msk [vmem:[#allocation2] sm:$0xff] %vm73_vm0, %v135_v4 }
 0x1b0   :  { %v122_v6 = vsel %vm121_vm7, %v185_v57, %v118_v5 }
 0x1b1   :  { %v124_v7 = vmul.f32 %v122_v6, %v90_v43 }
 0x1b3   :  { %v130_v8 = vmul.f32 %v178_v60, %v124_v7 }
 0x1b5   :  { %v136_v9 = vadd.f32 %v179_v0, %v130_v8 }
 0x1b7   :  { %138 = vst.msk [vmem:[#allocation2 + $0x8] sm:$0xff] %vm73_vm0, %v136_v9 }
 0x1b8   :  { %151 = dma.vmem_to_hbm [thread:$0]  %s144_s15, 256, %s146_s18, [#allocation3], %s214_s5, %s214_s5, %s215_s19  }
 0x1b9   :  { %210 = dma.done.wait [#allocation3], 256  }
 0x1ba   :  { %211 = vsyncadd [#allocation3], 4294967040 }
 0x1bb   :  { %156 = vsyncpa [#allocation3], 1 }

</bundles_post_ra>
